<compile_context>
chip_gen: v5e
topology: v5e:2x2
jax: 0.10.0
libtpu: 0.0.40
codegen_flags: <defaults>
</compile_context>

<pallas_src>
import functools

import jax
import jax.numpy as jnp
from jax.experimental import pallas as pl
from jax.experimental.pallas import tpu as pltpu

IN_F = 18
HID = 200
HID_PAD = 256   # lane-dense hidden width (multiple of 128)
OUT_F = 1
N_DD = 4
LANE = 128


def _cdiv(a, b):
    return (a + b - 1) // b


def _round_up(n, m):
    return ((n + m - 1) // m) * m


def _choose_tiling(B, max_tile):
    """Pick (TILE_B, n_tiles, B_pad).

    TILE_B is a multiple of 128 (lane-dense output rows), sized from B so the
    last tile isn't mostly padding, with >= 2 grid steps whenever the batch
    spans more than one 128-row block (v7x megacore sharding)."""
    max_tile = max(LANE, _round_up(max_tile, LANE))
    min_tiles = 2 if B > LANE else 1
    n_tiles = max(min_tiles, _cdiv(B, max_tile))
    tile_b = max(LANE, _round_up(_cdiv(B, n_tiles), LANE))
    n_tiles = max(min_tiles, _cdiv(B, tile_b))
    return tile_b, n_tiles, tile_b * n_tiles


def ddnet_kernel(x_ref,    # (TILE_B, IN_F)            f32
                 w0_ref,   # (IN_F, HID_PAD)           f32
                 b0_ref,   # (1, HID_PAD)              f32
                 wd_ref,   # (N_DD, HID_PAD, HID_PAD)  bf16
                 bd_ref,   # (N_DD, 1, HID_PAD)        f32
                 w2_ref,   # (1, HID_PAD)              f32
                 b2_ref,   # (1, 1)                    f32
                 o_ref):   # (1, TILE_B // 128, 128)   f32
    tile_b = x_ref.shape[0]
    # Two independent row sub-chunks give the scheduler independent matmul
    # chains: chunk A's layer-k matmul overlaps chunk B's VPU epilogue
    # (bias + gate + bf16 cast).  Mostly helps v5e/v6e (sequential MRF drain).
    n_sub = 2 if (tile_b % (2 * LANE) == 0) else 1
    sub = tile_b // n_sub
    rows = sub // LANE

    for s in range(n_sub):
        xs = x_ref[s * sub:(s + 1) * sub, :]
        # fc0 kept in f32: K=18 so MXU cost is negligible, input precision kept.
        c = jnp.dot(xs, w0_ref[...], preferred_element_type=jnp.float32)
        c = c + b0_ref[...]

        # Four gated dd layers: h = (h @ Wd_k + bd_k) * c  (bf16 MXU, f32 acc).
        h = c
        for k in range(N_DD):
            hk = jnp.dot(h.astype(jnp.bfloat16), wd_ref[k],
                         preferred_element_type=jnp.float32)
            h = (hk + bd_ref[k]) * c

        # fc2 (HID -> 1) as VPU multiply + XLU lane reduction, packed
        # lane-dense: local batch row g*128 + r  ->  o_ref[0, g, r].
        hg = h.reshape(rows, LANE, HID_PAD)
        out = jnp.sum(hg * w2_ref[...], axis=-1) + b2_ref[...]
        o_ref[0, s * rows:(s + 1) * rows, :] = out.astype(o_ref.dtype)


@functools.partial(jax.jit, static_argnames=("tile_b",))
def ddnet_forward(x, packed, tile_b=2048):
    """x: (B, 18) float32.  packed: dict from pack_params()."""
    B = x.shape[0]
    TILE_B, n_tiles, B_pad = _choose_tiling(B, tile_b)
    if B_pad != B:
        x = jnp.pad(x, ((0, B_pad - B), (0, 0)))

    tile_rows = TILE_B // LANE
    const2 = lambda i: (0, 0)
    const3 = lambda i: (0, 0, 0)

    in_specs = [
        pl.BlockSpec((TILE_B, IN_F), lambda i: (i, 0)),      # x tile (pipelined)
        pl.BlockSpec((IN_F, HID_PAD), const2),               # w0 (resident)
        pl.BlockSpec((1, HID_PAD), const2),                  # b0
        pl.BlockSpec((N_DD, HID_PAD, HID_PAD), const3),      # wd stack
        pl.BlockSpec((N_DD, 1, HID_PAD), const3),            # bd stack
        pl.BlockSpec((1, HID_PAD), const2),                  # w2 row
        pl.BlockSpec((1, 1), const2),                        # b2
    ]

    # Advisory cost estimate for the XLA scheduler (negligible standalone).
    flops = 2 * B_pad * (IN_F * HID_PAD + N_DD * HID_PAD * HID_PAD + HID_PAD)
    weight_bytes = sum(int(a.size) * a.dtype.itemsize for a in packed.values())
    bytes_accessed = B_pad * IN_F * 4 + B_pad * 4 + weight_bytes

    out = pl.pallas_call(
        ddnet_kernel,
        out_shape=jax.ShapeDtypeStruct((n_tiles, tile_rows, LANE), jnp.float32),
        grid_spec=pltpu.PrefetchScalarGridSpec(
            num_scalar_prefetch=0,
            grid=(n_tiles,),
            in_specs=in_specs,
            out_specs=pl.BlockSpec((1, tile_rows, LANE), lambda i: (i, 0, 0)),
        ),
        compiler_params=pltpu.CompilerParams(
            dimension_semantics=("parallel",),
            vmem_limit_bytes=48 * 1024 * 1024,
        ),
        cost_estimate=pl.CostEstimate(
            flops=flops, transcendentals=0, bytes_accessed=bytes_accessed),
    )(x,
      packed["w0"], packed["b0"],
      packed["wd"], packed["bd"],
      packed["w2"], packed["b2"])

    # (n_tiles, TILE_B//128, 128) row-major == (B_pad, 1) row-major.
    return out.reshape(B_pad, OUT_F)[:B]


def init_params(key):
    """Deterministic synthetic parameters matching the PyTorch module shapes.

    PyTorch nn.Linear stores weight as (out, in); we store the transpose
    (in, out) so the forward computes x @ W.  Biases are (1, out).
    """
    keys = jax.random.split(key, 12)
    scale = 0.05

    def w(k, shape):
        return (scale * jax.random.normal(k, shape)).astype(jnp.float32)

    return {
        "w0":  w(keys[0], (IN_F, HID)),
        "b0":  w(keys[1], (1, HID)),
        "wd1": w(keys[2], (HID, HID)),
        "bd1": w(keys[3], (1, HID)),
        "wd2": w(keys[4], (HID, HID)),
        "bd2": w(keys[5], (1, HID)),
        "wd3": w(keys[6], (HID, HID)),
        "bd3": w(keys[7], (1, HID)),
        "wd4": w(keys[8], (HID, HID)),
        "bd4": w(keys[9], (1, HID)),
        "w2":  w(keys[10], (HID, OUT_F)),
        "b2":  w(keys[11], (1, OUT_F)),
    }


def pack_params(p):
    """Pad hidden dim to 256 (lane-dense), cast dd matmul weights to bf16,
    stack the 4 dd layers into single operands.  fc0 stays f32."""
    padc = HID_PAD - HID

    def pad_cols(a):                       # (..., HID) -> (..., HID_PAD)
        return jnp.pad(a, ((0, 0), (0, padc)))

    w0 = pad_cols(p["w0"]).astype(jnp.float32)                        # (18, 256)
    b0 = pad_cols(p["b0"]).astype(jnp.float32)                        # (1, 256)
    wd = jnp.stack([
        jnp.pad(p[f"wd{k}"], ((0, padc), (0, padc)))
        for k in range(1, 5)
    ]).astype(jnp.bfloat16)                                           # (4, 256, 256)
    bd = jnp.stack([pad_cols(p[f"bd{k}"]) for k in range(1, 5)]
                   ).astype(jnp.float32)                              # (4, 1, 256)
    w2 = jnp.pad(p["w2"], ((0, padc), (0, 0))).T.astype(jnp.float32)  # (1, 256)
    b2 = p["b2"].astype(jnp.float32)                                  # (1, 1)
    return {"w0": w0, "b0": b0, "wd": wd, "bd": bd, "w2": w2, "b2": b2}


def ddnet_reference(x, p):
    """Pure-JAX reference with matching precision (f32 fc0/fc2, bf16 dd matmuls)."""
    def mm_bf16(a, w):
        return jnp.dot(a.astype(jnp.bfloat16), w.astype(jnp.bfloat16),
                       preferred_element_type=jnp.float32)

    c = x @ p["w0"] + p["b0"]
    h = c
    for k in range(1, 5):
        h = (mm_bf16(h, p[f"wd{k}"]) + p[f"bd{k}"]) * c
    return h @ p["w2"] + p["b2"]


if __name__ == "__main__":
    key = jax.random.PRNGKey(0)
    k_x, k_p = jax.random.split(key)

    params = init_params(k_p)
    packed = pack_params(params)

    # Small-batch case (single 128-row tile).
    B = 8
    x = jax.random.normal(k_x, (B, IN_F), dtype=jnp.float32)
    out = jax.block_until_ready(ddnet_forward(x, packed))
    ref = ddnet_reference(x, params)
    assert out.shape == (B, OUT_F)
    assert jnp.allclose(out, ref, rtol=2e-2, atol=2e-3), (
        f"mismatch (B={B}): max abs err {jnp.max(jnp.abs(out - ref))}"
    )

    # Larger batch: exercises multi-tile grid (>=2 steps), batch padding, and
    # the in-kernel two-sub-chunk interleave path (TILE_B=256).
    B2 = 300
    x2 = jax.random.normal(k_x, (B2, IN_F), dtype=jnp.float32)
    out2 = jax.block_until_ready(ddnet_forward(x2, packed))
    ref2 = ddnet_reference(x2, params)
    assert out2.shape == (B2, OUT_F)
    assert jnp.allclose(out2, ref2, rtol=2e-2, atol=2e-3), (
        f"mismatch (B={B2}): max abs err {jnp.max(jnp.abs(out2 - ref2))}"
    )

    print("KERNEL_OK")
</pallas_src>

<mosaic_0001>
module attributes {stable_mosaic.version = 11 : i64} {
  func.func @ddnet_kernel(%arg0: i32, %arg1: memref<128x18xf32, #tpu.memory_space<vmem>>, %arg2: memref<18x256xf32, #tpu.memory_space<vmem>>, %arg3: memref<1x256xf32, #tpu.memory_space<vmem>>, %arg4: memref<4x256x256xbf16, #tpu.memory_space<vmem>>, %arg5: memref<4x1x256xf32, #tpu.memory_space<vmem>>, %arg6: memref<1x256xf32, #tpu.memory_space<vmem>>, %arg7: memref<1x1xf32, #tpu.memory_space<vmem>>, %arg8: memref<1x1x128xf32, #tpu.memory_space<vmem>>) attributes {dimension_semantics = [#tpu.dimension_semantics<parallel>], iteration_bounds = array<i64: 1>, scalar_prefetch = 0 : i64, scratch_operands = 0 : i64, tpu.core_type = #tpu.core_type<tc>, window_params = [{transform_indices = @transform_0, window_bounds = array<i64: 128, 18>}, {pipeline_mode = #tpu.pipeline_mode<synchronous>, transform_indices = @transform_1, window_bounds = array<i64: 18, 256>}, {pipeline_mode = #tpu.pipeline_mode<synchronous>, transform_indices = @transform_2, window_bounds = array<i64: 1, 256>}, {pipeline_mode = #tpu.pipeline_mode<synchronous>, transform_indices = @transform_3, window_bounds = array<i64: 4, 256, 256>}, {pipeline_mode = #tpu.pipeline_mode<synchronous>, transform_indices = @transform_4, window_bounds = array<i64: 4, 1, 256>}, {pipeline_mode = #tpu.pipeline_mode<synchronous>, transform_indices = @transform_5, window_bounds = array<i64: 1, 256>}, {pipeline_mode = #tpu.pipeline_mode<synchronous>, transform_indices = @transform_6, window_bounds = array<i64: 1, 1>}, {transform_indices = @transform_7, window_bounds = array<i64: 1, 1, 128>}]} {
    %c0 = arith.constant 0 : index
    %c0_0 = arith.constant 0 : index
    %0 = vector.load %arg1[%c0, %c0_0] : memref<128x18xf32, #tpu.memory_space<vmem>>, vector<128x18xf32>
    %c0_1 = arith.constant 0 : index
    %c0_2 = arith.constant 0 : index
    %1 = vector.load %arg2[%c0_1, %c0_2] : memref<18x256xf32, #tpu.memory_space<vmem>>, vector<18x256xf32>
    %cst = arith.constant dense<0.000000e+00> : vector<128x256xf32>
    %2 = tpu.matmul %0, %1, %cst {dimension_numbers = #tpu.dot_dimension_numbers<[1], [0], [0], [1], [0, 0, 1, 1], [], []>} : vector<128x18xf32>, vector<18x256xf32>, vector<128x256xf32> -> vector<128x256xf32>
    %c0_3 = arith.constant 0 : index
    %c0_4 = arith.constant 0 : index
    %3 = vector.load %arg3[%c0_3, %c0_4] : memref<1x256xf32, #tpu.memory_space<vmem>>, vector<1x256xf32>
    %4 = vector.broadcast %3 : vector<1x256xf32> to vector<128x256xf32>
    %5 = arith.addf %2, %4 : vector<128x256xf32>
    %6 = arith.truncf %5 : vector<128x256xf32> to vector<128x256xbf16>
    %c0_5 = arith.constant 0 : index
    %c0_6 = arith.constant 0 : index
    %c0_7 = arith.constant 0 : index
    %7 = vector.load %arg4[%c0_5, %c0_6, %c0_7] : memref<4x256x256xbf16, #tpu.memory_space<vmem>>, vector<1x256x256xbf16>
    %8 = vector.shape_cast %7 : vector<1x256x256xbf16> to vector<256x256xbf16>
    %cst_8 = arith.constant dense<0.000000e+00> : vector<128x256xf32>
    %9 = tpu.matmul %6, %8, %cst_8 {dimension_numbers = #tpu.dot_dimension_numbers<[1], [0], [0], [1], [0, 0, 1, 1], [], []>} : vector<128x256xbf16>, vector<256x256xbf16>, vector<128x256xf32> -> vector<128x256xf32>
    %c0_9 = arith.constant 0 : index
    %c0_10 = arith.constant 0 : index
    %c0_11 = arith.constant 0 : index
    %10 = vector.load %arg5[%c0_9, %c0_10, %c0_11] : memref<4x1x256xf32, #tpu.memory_space<vmem>>, vector<1x1x256xf32>
    %11 = vector.shape_cast %10 : vector<1x1x256xf32> to vector<1x256xf32>
    %12 = vector.broadcast %11 : vector<1x256xf32> to vector<128x256xf32>
    %13 = arith.addf %9, %12 : vector<128x256xf32>
    %14 = arith.mulf %13, %5 : vector<128x256xf32>
    %15 = arith.truncf %14 : vector<128x256xf32> to vector<128x256xbf16>
    %c1 = arith.constant 1 : index
    %c0_12 = arith.constant 0 : index
    %c0_13 = arith.constant 0 : index
    %16 = vector.load %arg4[%c1, %c0_12, %c0_13] : memref<4x256x256xbf16, #tpu.memory_space<vmem>>, vector<1x256x256xbf16>
    %17 = vector.shape_cast %16 : vector<1x256x256xbf16> to vector<256x256xbf16>
    %cst_14 = arith.constant dense<0.000000e+00> : vector<128x256xf32>
    %18 = tpu.matmul %15, %17, %cst_14 {dimension_numbers = #tpu.dot_dimension_numbers<[1], [0], [0], [1], [0, 0, 1, 1], [], []>} : vector<128x256xbf16>, vector<256x256xbf16>, vector<128x256xf32> -> vector<128x256xf32>
    %c1_15 = arith.constant 1 : index
    %c0_16 = arith.constant 0 : index
    %c0_17 = arith.constant 0 : index
    %19 = vector.load %arg5[%c1_15, %c0_16, %c0_17] : memref<4x1x256xf32, #tpu.memory_space<vmem>>, vector<1x1x256xf32>
    %20 = vector.shape_cast %19 : vector<1x1x256xf32> to vector<1x256xf32>
    %21 = vector.broadcast %20 : vector<1x256xf32> to vector<128x256xf32>
    %22 = arith.addf %18, %21 : vector<128x256xf32>
    %23 = arith.mulf %22, %5 : vector<128x256xf32>
    %24 = arith.truncf %23 : vector<128x256xf32> to vector<128x256xbf16>
    %c2 = arith.constant 2 : index
    %c0_18 = arith.constant 0 : index
    %c0_19 = arith.constant 0 : index
    %25 = vector.load %arg4[%c2, %c0_18, %c0_19] : memref<4x256x256xbf16, #tpu.memory_space<vmem>>, vector<1x256x256xbf16>
    %26 = vector.shape_cast %25 : vector<1x256x256xbf16> to vector<256x256xbf16>
    %cst_20 = arith.constant dense<0.000000e+00> : vector<128x256xf32>
    %27 = tpu.matmul %24, %26, %cst_20 {dimension_numbers = #tpu.dot_dimension_numbers<[1], [0], [0], [1], [0, 0, 1, 1], [], []>} : vector<128x256xbf16>, vector<256x256xbf16>, vector<128x256xf32> -> vector<128x256xf32>
    %c2_21 = arith.constant 2 : index
    %c0_22 = arith.constant 0 : index
    %c0_23 = arith.constant 0 : index
    %28 = vector.load %arg5[%c2_21, %c0_22, %c0_23] : memref<4x1x256xf32, #tpu.memory_space<vmem>>, vector<1x1x256xf32>
    %29 = vector.shape_cast %28 : vector<1x1x256xf32> to vector<1x256xf32>
    %30 = vector.broadcast %29 : vector<1x256xf32> to vector<128x256xf32>
    %31 = arith.addf %27, %30 : vector<128x256xf32>
    %32 = arith.mulf %31, %5 : vector<128x256xf32>
    %33 = arith.truncf %32 : vector<128x256xf32> to vector<128x256xbf16>
    %c3 = arith.constant 3 : index
    %c0_24 = arith.constant 0 : index
    %c0_25 = arith.constant 0 : index
    %34 = vector.load %arg4[%c3, %c0_24, %c0_25] : memref<4x256x256xbf16, #tpu.memory_space<vmem>>, vector<1x256x256xbf16>
    %35 = vector.shape_cast %34 : vector<1x256x256xbf16> to vector<256x256xbf16>
    %cst_26 = arith.constant dense<0.000000e+00> : vector<128x256xf32>
    %36 = tpu.matmul %33, %35, %cst_26 {dimension_numbers = #tpu.dot_dimension_numbers<[1], [0], [0], [1], [0, 0, 1, 1], [], []>} : vector<128x256xbf16>, vector<256x256xbf16>, vector<128x256xf32> -> vector<128x256xf32>
    %c3_27 = arith.constant 3 : index
    %c0_28 = arith.constant 0 : index
    %c0_29 = arith.constant 0 : index
    %37 = vector.load %arg5[%c3_27, %c0_28, %c0_29] : memref<4x1x256xf32, #tpu.memory_space<vmem>>, vector<1x1x256xf32>
    %38 = vector.shape_cast %37 : vector<1x1x256xf32> to vector<1x256xf32>
    %39 = vector.broadcast %38 : vector<1x256xf32> to vector<128x256xf32>
    %40 = arith.addf %36, %39 : vector<128x256xf32>
    %41 = arith.mulf %40, %5 : vector<128x256xf32>
    %42 = vector.shape_cast %41 : vector<128x256xf32> to vector<1x128x256xf32>
    %c0_30 = arith.constant 0 : index
    %c0_31 = arith.constant 0 : index
    %43 = vector.load %arg6[%c0_30, %c0_31] : memref<1x256xf32, #tpu.memory_space<vmem>>, vector<1x256xf32>
    %44 = vector.shape_cast %43 : vector<1x256xf32> to vector<1x1x256xf32>
    %45 = vector.broadcast %44 : vector<1x1x256xf32> to vector<1x128x256xf32>
    %46 = arith.mulf %42, %45 : vector<1x128x256xf32>
    %cst_32 = arith.constant dense<0.000000e+00> : vector<1x128xf32>
    %47 = vector.multi_reduction <add>, %46, %cst_32 [2] : vector<1x128x256xf32> to vector<1x128xf32>
    %c0_33 = arith.constant 0 : index
    %c0_34 = arith.constant 0 : index
    %48 = vector.load %arg7[%c0_33, %c0_34] : memref<1x1xf32, #tpu.memory_space<vmem>>, vector<1x1xf32>
    %49 = vector.broadcast %48 : vector<1x1xf32> to vector<1x128xf32>
    %50 = arith.addf %47, %49 : vector<1x128xf32>
    %c0_35 = arith.constant 0 : index
    %c0_36 = arith.constant 0 : index
    %c0_37 = arith.constant 0 : index
    %51 = vector.load %arg8[%c0_35, %c0_36, %c0_37] : memref<1x1x128xf32, #tpu.memory_space<vmem>>, vector<1x1x128xf32>
    %52 = vector.shape_cast %51 : vector<1x1x128xf32> to vector<1x128xf32>
    %53 = vector.shape_cast %50 : vector<1x128xf32> to vector<1x1x128xf32>
    tpu.vector_store %arg8[%c0_35, %c0_36, %c0_37], %53 {strides = array<i32>} : memref<1x1x128xf32, #tpu.memory_space<vmem>>, vector<1x1x128xf32>,
    return
  }
  func.func @transform_0(%arg0: i32) -> (i32, i32) {
    %c0_i32 = arith.constant 0 : i32
    %c0_i32_0 = arith.constant 0 : i32
    return %arg0, %c0_i32 : i32, i32
  }
  func.func @transform_1(%arg0: i32) -> (i32, i32) {
    %c0_i32 = arith.constant 0 : i32
    %c0_i32_0 = arith.constant 0 : i32
    %c0_i32_1 = arith.constant 0 : i32
    return %c0_i32, %c0_i32_0 : i32, i32
  }
  func.func @transform_2(%arg0: i32) -> (i32, i32) {
    %c0_i32 = arith.constant 0 : i32
    %c0_i32_0 = arith.constant 0 : i32
    %c0_i32_1 = arith.constant 0 : i32
    return %c0_i32, %c0_i32_0 : i32, i32
  }
  func.func @transform_3(%arg0: i32) -> (i32, i32, i32) {
    %c0_i32 = arith.constant 0 : i32
    %c0_i32_0 = arith.constant 0 : i32
    %c0_i32_1 = arith.constant 0 : i32
    %c0_i32_2 = arith.constant 0 : i32
    return %c0_i32, %c0_i32_0, %c0_i32_1 : i32, i32, i32
  }
  func.func @transform_4(%arg0: i32) -> (i32, i32, i32) {
    %c0_i32 = arith.constant 0 : i32
    %c0_i32_0 = arith.constant 0 : i32
    %c0_i32_1 = arith.constant 0 : i32
    %c0_i32_2 = arith.constant 0 : i32
    return %c0_i32, %c0_i32_0, %c0_i32_1 : i32, i32, i32
  }
  func.func @transform_5(%arg0: i32) -> (i32, i32) {
    %c0_i32 = arith.constant 0 : i32
    %c0_i32_0 = arith.constant 0 : i32
    %c0_i32_1 = arith.constant 0 : i32
    return %c0_i32, %c0_i32_0 : i32, i32
  }
  func.func @transform_6(%arg0: i32) -> (i32, i32) {
    %c0_i32 = arith.constant 0 : i32
    %c0_i32_0 = arith.constant 0 : i32
    %c0_i32_1 = arith.constant 0 : i32
    return %c0_i32, %c0_i32_0 : i32, i32
  }
  func.func @transform_7(%arg0: i32) -> (i32, i32, i32) {
    %c0_i32 = arith.constant 0 : i32
    %c0_i32_0 = arith.constant 0 : i32
    %c0_i32_1 = arith.constant 0 : i32
    return %arg0, %c0_i32, %c0_i32_0 : i32, i32, i32
  }
}

</mosaic_0001>

<bundles_post_ra>
// kernel: ddnet_forward.1
= control target key start
LH: loop header
LB: loop body
LE: loop exit
PB: predicated region body
PF: predicated region fallthrough
CT: control target
= control target key end

     0   :  { %s3597_s0 = inlined_call_operand.vmem [shape: f32[128,18], index: 0, kind: input, shape index: {}]   ;;  %s3598_s1 = inlined_call_operand.vmem [shape: f32[18,256], index: 1, kind: input, shape index: {}]   ;;  %s3599_s2 = inlined_call_operand.vmem [shape: f32[1,256], index: 2, kind: input, shape index: {}]   ;;  %s3600_s3 = inlined_call_operand.hbm [shape: bf16[4,256,256], index: 3, kind: input, shape index: {}]   ;;  %s3601_s4 = inlined_call_operand.vmem [shape: f32[4,1,256], index: 4, kind: input, shape index: {}]   ;;  %s3602_s5 = inlined_call_operand.vmem [shape: f32[1,256], index: 5, kind: input, shape index: {}]   ;;  %s3603_s6 = inlined_call_operand.<no memory space> [shape: f32[1,1], index: 6, kind: input, shape index: {}]   ;;  %s3604_s7 = inlined_call_operand.vmem [shape: f32[1,1,128], index: 7, kind: output, shape index: {}]  }
   0x1   :  { %v12_v0 = vstv %s3603_s6 }
   0x2   :  { %13 = vst [vmem:[#allocation2] sm:$0x1] %v12_v0 }
   0x3   :  { %14 = vsyncpa [#allocation4], 0  ;;  %s25_s28 = sshll.u32 %s3600_s3, 4  ;;  %s2941_s29 = smov [#allocation3]   ;;  %s26_s28 = int_to_ptr.hbm [resolvable:$true] %s25_s28 }
   0x4   :  { %s27_s30 = sshll.u32 %s2941_s29, 4  ;;  %s2942_s8 = smov 128   ;;  %s28_s30 = int_to_ptr.vmem [resolvable:$true] %s27_s30 }
   0x5   :  { %s2943_s9 = smov 8  }
   0x6   :  { %33 = dma.hbm_to_vmem [thread:$0]  %s26_s28, 16384, %s28_s30, [#allocation4], %s2942_s8, %s2942_s8, %s2943_s9  }
   0x7   :  { %2939 = dma.done.wait [#allocation4], 16384  }
   0x8   :  { %2940 = vsyncadd [#allocation4], 4294950912  ;;  %vm121_vm0 = vcmask 1041408   ;;  %v64_v1 = vld [vmem:[%s3598_s1 + $0x20] sm:$0x3]  ;;  %v62_v3 = vld [vmem:[%s3598_s1 + $0x10] sm:$0xff] }
   0x9   :  { %v65_v2 = vld [vmem:[%s3598_s1 + $0x28] sm:$0x3]  ;;  %2227 = vmatpush.msk.msra.mxu0 %vm121_vm0, %v64_v1  ;;  %v63_v4 = vld [vmem:[%s3598_s1 + $0x18] sm:$0xff]  ;;  %v60_v5 = vld [vmem:[%s3598_s1] sm:$0xff]  ;;  %2904 = vmatpush.msk.msra.mxu2 %vm121_vm0, %v64_v1  ;;  %vm72_vm1 = vcmask 146432   ;;  %vm2162_vm2 = vcmask 130112  }
   0xa   :  { %2244 = vmatpush.msk.msra.mxu1 %vm121_vm0, %v65_v2  ;;  %v61_v6 = vld [vmem:[%s3598_s1 + $0x8] sm:$0xff]  ;;  %2907 = vmatpush.msk.msra.mxu3 %vm121_vm0, %v65_v2  ;;  %v44_v7 = vld [vmem:[%s3597_s0] sm:$0xff]  ;;  %v46_v9 = vld [vmem:[%s3597_s0 + $0x10] sm:$0xff]  ;;  %vm2166_vm3 = vcmask 195712   ;;  %vm2170_vm4 = vcmask 261312   ;;  %vm2174_vm5 = vcmask 326912  }
   0xb   :  { %142 = vmatpush.msra.mxu0 %v62_v3  ;;  %2905 = vmatpush.msra.mxu2 %v62_v3  ;;  %v45_v8 = vld [vmem:[%s3597_s0 + $0x8] sm:$0xff]  ;;  %v3027_v10 = vld [vmem:[%s3597_s0 + $0x40] sm:$0xff]  ;;  %v47_v11 = vld [vmem:[%s3597_s0 + $0x18] sm:$0xff]  ;;  %vm2178_vm6 = vcmask 392512   ;;  %vm2182_vm7 = vcmask 458112   ;;  %vm2186_vm8 = vcmask 523712  }
   0xc   :  { %207 = vmatpush.msra.mxu1 %v63_v4  ;;  %2908 = vmatpush.msra.mxu3 %v63_v4  ;;  %v53_v12 = vld [vmem:[%s3597_s0 + $0x48] sm:$0xff]  ;;  %v48_v13 = vld [vmem:[%s3597_s0 + $0x20] sm:$0xff]  ;;  %v54_v14 = vld [vmem:[%s3597_s0 + $0x50] sm:$0xff]  ;;  %vm2190_vm9 = vcmask 589312   ;;  %vm2194_vm10 = vcmask 654912   ;;  %vm2198_vm11 = vcmask 720512  }
   0xd   :  { %143 = vmatpush.msra.mxu0 %v60_v5  ;;  %2906 = vmatpush.msra.mxu2 %v60_v5  ;;  %v2790_v15 = vld [vmem:[#allocation3 + $0x74] sm:$0xf]  ;;  %v2321_v16 = vld [vmem:[#allocation3 + $0x78] sm:$0xf0]  ;;  %v2383_v18 = vld [vmem:[#allocation3 + $0xf0] sm:$0xf] }
   0xe   :  { %208 = vmatpush.msra.mxu1 %v61_v6  ;;  %2228 = vmatmul.msk.f32.vlgmr.msra.gmra.mxu0 %vm72_vm1, %v44_v7  ;;  %v2324_v17 = vor.u32 %v2790_v15, %v2321_v16  ;;  %v2807_v19 = vld [vmem:[#allocation3 + $0xf4] sm:$0xf0]  ;;  %v2319_v21 = vld [vmem:[#allocation3 + $0x70] sm:$0xf]  ;;  %v2788_v23 = vld [vmem:[#allocation3 + $0x64] sm:$0xf] }
   0xf   :  { %2245 = vmatmul.msk.f32.vlgmr.msra.gmra.mxu1 %vm72_vm1, %v44_v7  ;;  %2909 = vmatpush.msra.mxu3 %v61_v6  ;;  %v2384_v20 = vor.u32 %v2807_v19, %v2383_v18  ;;  %v2791_v22 = vld [vmem:[#allocation3 + $0x74] sm:$0xf0]  ;;  %v49_v24 = vld [vmem:[%s3597_s0 + $0x28] sm:$0xff]  ;;  %v2375_v27 = vld [vmem:[#allocation3 + $0xe0] sm:$0xf]  ;;  %vm2202_vm12 = vcmask 786112  }
  0x10   :  { %2253 = vmatmul.msk.f32.vlgmr.msra.gmra.mxu3 %vm72_vm1, %v3027_v10  ;;  %2237 = vmatmul.msk.f32.vlgmr.msra.gmra.mxu2 %vm72_vm1, %v53_v12  ;;  %v2320_v25 = vor.u32 %v2791_v22, %v2319_v21  ;;  %v2313_v26 = vld [vmem:[#allocation3 + $0x68] sm:$0xf0]  ;;  %v2805_v28 = vld [vmem:[#allocation3 + $0xe4] sm:$0xf0]  ;;  %v2806_v30 = vld [vmem:[#allocation3 + $0xf4] sm:$0xf] }
  0x11   :  { %570 = vmatpush.bf16.msrb.mxu0 %v2324_v17  ;;  %521 = vmatpush.bf16.msrb.mxu3 %v2384_v20  ;;  %v2316_v29 = vor.u32 %v2788_v23, %v2313_v26  ;;  %v2385_v31 = vld [vmem:[#allocation3 + $0xf8] sm:$0xf0]  ;;  %v2311_v32 = vld [vmem:[#allocation3 + $0x60] sm:$0xf]  ;;  %v2789_v35 = vld [vmem:[#allocation3 + $0x64] sm:$0xf0]  ;;  %v2376_v37 = vor.u32 %v2805_v28, %v2375_v27 }
  0x12   :  { %v55_v33 = vld [vmem:[%s3597_s0 + $0x58] sm:$0xff]  ;;  %472 = vmatpush.bf16.msrb.mxu2 %v2320_v25  ;;  %v2388_v34 = vor.u32 %v2806_v30, %v2385_v31  ;;  %v2367_v36 = vld [vmem:[#allocation3 + $0xd0] sm:$0xf]  ;;  %v2312_v38 = vor.u32 %v2789_v35, %v2311_v32  ;;  %v2804_v43 = vld [vmem:[#allocation3 + $0xe4] sm:$0xf]  ;;  %vm2206_vm13 = vcmask 851712  }
  0x13   :  { %v2803_v39 = vld [vmem:[#allocation3 + $0xd4] sm:$0xf0]  ;;  %v2786_v40 = vld [vmem:[#allocation3 + $0x54] sm:$0xf]  ;;  %v2305_v41 = vld [vmem:[#allocation3 + $0x58] sm:$0xf0] }
  0x14   :  { %619 = vmatpush.bf16.msrb.mxu1 %v2388_v34  ;;  %v2308_v42 = vor.u32 %v2786_v40, %v2305_v41  ;;  %v2377_v44 = vld [vmem:[#allocation3 + $0xe8] sm:$0xf0]  ;;  %v2303_v45 = vld [vmem:[#allocation3 + $0x50] sm:$0xf]  ;;  %v2787_v47 = vld [vmem:[#allocation3 + $0x54] sm:$0xf0]  ;;  %v2368_v50 = vor.u32 %v2803_v39, %v2367_v36 }
  0x15   :  { %571 = vmatpush.bf16.msrb.mxu0 %v2316_v29  ;;  %v2380_v46 = vor.u32 %v2804_v43, %v2377_v44  ;;  %v2802_v48 = vld [vmem:[#allocation3 + $0xd4] sm:$0xf]  ;;  %v2369_v49 = vld [vmem:[#allocation3 + $0xd8] sm:$0xf0]  ;;  %522 = vmatpush.bf16.msrb.mxu3 %v2376_v37  ;;  %v2304_v51 = vor.u32 %v2787_v47, %v2303_v45  ;;  %v2359_v52 = vld [vmem:[#allocation3 + $0xc0] sm:$0xf] }
  0x16   :  { %2229 = vmatmul.msk.f32.gmra.mxu0 %vm72_vm1, %v45_v8  ;;  %473 = vmatpush.bf16.msrb.mxu2 %v2312_v38  ;;  %v2784_v53 = vld [vmem:[#allocation3 + $0x44] sm:$0xf]  ;;  %v2297_v54 = vld [vmem:[#allocation3 + $0x48] sm:$0xf0]  ;;  %v2801_v55 = vld [vmem:[#allocation3 + $0xc4] sm:$0xf0]  ;;  %v2372_v56 = vor.u32 %v2802_v48, %v2369_v49 }
  0x17   :  { %2246 = vmatmul.msk.f32.gmra.mxu1 %vm72_vm1, %v45_v8  ;;  %v2300_v57 = vor.u32 %v2784_v53, %v2297_v54  ;;  %v2295_v58 = vld [vmem:[#allocation3 + $0x40] sm:$0xf]  ;;  %v2785_v59 = vld [vmem:[#allocation3 + $0x44] sm:$0xf0]  ;;  %v2800_v60 = vld [vmem:[#allocation3 + $0xc4] sm:$0xf]  ;;  %v2360_v1 = vor.u32 %v2801_v55, %v2359_v52 }
  0x18   :  { %2254 = vmatmul.msk.f32.gmra.mxu3 %vm72_vm1, %v53_v12  ;;  %2238 = vmatmul.msk.f32.gmra.mxu2 %vm72_vm1, %v54_v14  ;;  %v2361_v61 = vld [vmem:[#allocation3 + $0xc8] sm:$0xf0]  ;;  %v56_v63 = vld [vmem:[%s3597_s0 + $0x60] sm:$0xff]  ;;  %v2782_v0 = vld [vmem:[#allocation3 + $0x34] sm:$0xf]  ;;  %v2296_v2 = vor.u32 %v2785_v59, %v2295_v58  ;;  %vm2210_vm14 = vcmask 917312  }
  0x19   :  { %572 = vmatpush.bf16.msrb.mxu0 %v2308_v42  ;;  %620 = vmatpush.bf16.msrb.mxu1 %v2380_v46  ;;  %v50_v62 = vld [vmem:[%s3597_s0 + $0x30] sm:$0xff]  ;;  %v2799_v4 = vld [vmem:[#allocation3 + $0xb4] sm:$0xf0]  ;;  %v2289_v5 = vld [vmem:[#allocation3 + $0x38] sm:$0xf0]  ;;  %v2364_v6 = vor.u32 %v2800_v60, %v2361_v61  ;;  %vm2214_vm15 = vcmask 982912  }
  0x1a   :  { %523 = vmatpush.bf16.msrb.mxu3 %v2368_v50  ;;  %474 = vmatpush.bf16.msrb.mxu2 %v2304_v51  ;;  %v2351_v3 = vld [vmem:[#allocation3 + $0xb0] sm:$0xf]  ;;  %v2783_v8 = vld [vmem:[#allocation3 + $0x34] sm:$0xf0]  ;;  %v2353_v12 = vld [vmem:[#allocation3 + $0xb8] sm:$0xf0] }
  0x1b   :  { %v2287_v7 = vld [vmem:[#allocation3 + $0x30] sm:$0xf]  ;;  %v2352_v15 = vor.u32 %v2799_v4, %v2351_v3  ;;  %v2343_v17 = vld [vmem:[#allocation3 + $0xa0] sm:$0xf]  ;;  %v2797_v18 = vld [vmem:[#allocation3 + $0xa4] sm:$0xf0] }
  0x1c   :  { %v2288_v16 = vor.u32 %v2783_v8, %v2287_v7  ;;  %v2279_v20 = vld [vmem:[#allocation3 + $0x20] sm:$0xf]  ;;  %v2781_v21 = vld [vmem:[#allocation3 + $0x24] sm:$0xf0]  ;;  %v2796_v23 = vld [vmem:[#allocation3 + $0xa4] sm:$0xf]  ;;  %v2344_v27 = vor.u32 %v2797_v18, %v2343_v17 }
  0x1d   :  { %621 = vmatpush.bf16.msrb.mxu1 %v2372_v56  ;;  %573 = vmatpush.bf16.msrb.mxu0 %v2300_v57  ;;  %v51_v25 = vld [vmem:[%s3597_s0 + $0x38] sm:$0xff]  ;;  %v57_v26 = vld [vmem:[%s3597_s0 + $0x68] sm:$0xff]  ;;  %v2280_v28 = vor.u32 %v2781_v21, %v2279_v20  ;;  %v2271_v29 = vld [vmem:[#allocation3 + $0x10] sm:$0xf]  ;;  %vm2218_vm0 = vcmask 1048512  }
  0x1e   :  { %2230 = vmatmul.msk.f32.gmra.mxu0 %vm72_vm1, %v46_v9  ;;  %524 = vmatpush.bf16.msrb.mxu3 %v2360_v1  ;;  %v2779_v30 = vld [vmem:[#allocation3 + $0x14] sm:$0xf0]  ;;  %v2335_v31 = vld [vmem:[#allocation3 + $0x90] sm:$0xf]  ;;  %v2778_v38 = vld [vmem:[#allocation3 + $0x14] sm:$0xf] }
  0x1f   :  { %2247 = vmatmul.msk.f32.gmra.mxu1 %vm72_vm1, %v46_v9  ;;  %v2292_v9 = vor.u32 %v2782_v0, %v2289_v5  ;;  %475 = vmatpush.bf16.msrb.mxu2 %v2296_v2  ;;  %v2795_v32 = vld [vmem:[#allocation3 + $0x94] sm:$0xf0]  ;;  %v2272_v34 = vor.u32 %v2779_v30, %v2271_v29  ;;  %v58_v36 = vld [vmem:[%s3597_s0 + $0x70] sm:$0xff]  ;;  %v2273_v39 = vld [vmem:[#allocation3 + $0x18] sm:$0xf0] }
  0x20   :  { %2255 = vmatmul.msk.f32.gmra.mxu3 %vm72_vm1, %v54_v14  ;;  %2239 = vmatmul.msk.f32.gmra.mxu2 %vm72_vm1, %v55_v33  ;;  %v2281_v14 = vld [vmem:[#allocation3 + $0x28] sm:$0xf0]  ;;  %v2336_v35 = vor.u32 %v2795_v32, %v2335_v31  ;;  %v59_v37 = vld [vmem:[%s3597_s0 + $0x78] sm:$0xff]  ;;  %v2276_v40 = vor.u32 %v2778_v38, %v2273_v39  ;;  %v2263_v41 = vld [vmem:[#allocation3] sm:$0xf] }
  0x21   :  { %622 = vmatpush.bf16.msrb.mxu1 %v2364_v6  ;;  %574 = vmatpush.bf16.msrb.mxu0 %v2292_v9  ;;  %v2777_v42 = vld [vmem:[#allocation3 + $0x4] sm:$0xf0]  ;;  %v2794_v43 = vld [vmem:[#allocation3 + $0x94] sm:$0xf]  ;;  %v2327_v45 = vld [vmem:[#allocation3 + $0x80] sm:$0xf] }
  0x22   :  { %525 = vmatpush.bf16.msrb.mxu3 %v2352_v15  ;;  %v2264_v44 = vor.u32 %v2777_v42, %v2263_v41  ;;  %v2793_v46 = vld [vmem:[#allocation3 + $0x84] sm:$0xf0]  ;;  %v2776_v49 = vld [vmem:[#allocation3 + $0x4] sm:$0xf]  ;;  %v2265_v50 = vld [vmem:[#allocation3 + $0x8] sm:$0xf0] }
  0x23   :  { %476 = vmatpush.bf16.msrb.mxu2 %v2288_v16  ;;  %v2328_v48 = vor.u32 %v2793_v46, %v2327_v45  ;;  %v2792_v51 = vld [vmem:[#allocation3 + $0x84] sm:$0xf]  ;;  %v2268_v52 = vor.u32 %v2776_v49, %v2265_v50  ;;  %v2329_v53 = vld [vmem:[#allocation3 + $0x88] sm:$0xf0]  ;;  %v2448_v57 = vld [vmem:[#allocation3 + $0x170] sm:$0xf] }
  0x24   :  { %v2332_v54 = vor.u32 %v2792_v51, %v2329_v53  ;;  %v2823_v58 = vld [vmem:[#allocation3 + $0x174] sm:$0xf0]  ;;  %v2512_v59 = vld [vmem:[#allocation3 + $0x1f0] sm:$0xf]  ;;  %v66_v60 = vld [vmem:[%s3599_s2] sm:$0x3] }
  0x25   :  { %v2449_v61 = vor.u32 %v2823_v58, %v2448_v57  ;;  %v3096_v0 = vperm.slane %v66_v60, 0  ;;  %v3098_v1 = vperm.slane %v66_v60, 1  ;;  %v2822_v8 = vld [vmem:[#allocation3 + $0x174] sm:$0xf]  ;;  %v2450_v9 = vld [vmem:[#allocation3 + $0x178] sm:$0xf0] }
  0x26   :  { %2231 = vmatmul.msk.f32.gmra.mxu0 %vm72_vm1, %v47_v11  ;;  %526 = vmatpush.bf16.msrb.mxu3 %v2344_v27  ;;  %v2821_v20 = vld [vmem:[#allocation3 + $0x164] sm:$0xf0]  ;;  %v2504_v21 = vld [vmem:[#allocation3 + $0x1e0] sm:$0xf]  ;;  %v2820_v31 = vld [vmem:[#allocation3 + $0x164] sm:$0xf] }
  0x27   :  { %2248 = vmatmul.msk.f32.gmra.mxu1 %vm72_vm1, %v47_v11  ;;  %v2798_v11 = vld [vmem:[#allocation3 + $0xb4] sm:$0xf]  ;;  %477 = vmatpush.bf16.msrb.mxu2 %v2280_v28  ;;  %v2442_v32 = vld [vmem:[#allocation3 + $0x168] sm:$0xf0]  ;;  %v2432_v39 = vld [vmem:[#allocation3 + $0x150] sm:$0xf] }
  0x28   :  { %2256 = vmatmul.msk.f32.gmra.mxu3 %vm72_vm1, %v55_v33  ;;  %2240 = vmatmul.msk.f32.gmra.mxu2 %vm72_vm1, %v56_v63  ;;  %v2356_v19 = vor.u32 %v2798_v11, %v2353_v12  ;;  %v2838_v11 = vld [vmem:[#allocation3 + $0x1f4] sm:$0xf]  ;;  %v2453_v12 = vor.u32 %v2822_v8, %v2450_v9  ;;  %v2496_v41 = vld [vmem:[#allocation3 + $0x1d0] sm:$0xf]  ;;  %v2498_v50 = vld [vmem:[#allocation3 + $0x1d8] sm:$0xf0] }
  0x29   :  { %v2818_v46 = vld [vmem:[#allocation3 + $0x154] sm:$0xf]  ;;  %v2816_v8 = vld [vmem:[#allocation3 + $0x144] sm:$0xf]  ;;  %v2426_v9 = vld [vmem:[#allocation3 + $0x148] sm:$0xf0] }
  0x2a   :  { %623 = vmatpush.bf16.msrb.mxu1 %v2356_v19  ;;  %527 = vmatpush.bf16.msrb.mxu3 %v2336_v35  ;;  %v2440_v19 = vld [vmem:[#allocation3 + $0x160] sm:$0xf]  ;;  %v2506_v35 = vld [vmem:[#allocation3 + $0x1e8] sm:$0xf0] }
  0x2b   :  { %478 = vmatpush.bf16.msrb.mxu2 %v2272_v34  ;;  %v2445_v34 = vor.u32 %v2820_v31, %v2442_v32  ;;  %v2416_v32 = vld [vmem:[#allocation3 + $0x130] sm:$0xf] }
  0x2e   :  { %2232 = vmatmul.msk.f32.gmra.mxu0 %vm72_vm1, %v48_v13  ;;  %528 = vmatpush.bf16.msrb.mxu3 %v2328_v48  ;;  %v2834_v48 = vld [vmem:[#allocation3 + $0x1d4] sm:$0xf] }
  0x2f   :  { %2249 = vmatmul.msk.f32.gmra.mxu1 %vm72_vm1, %v48_v13  ;;  %v2780_v13 = vld [vmem:[#allocation3 + $0x24] sm:$0xf]  ;;  %479 = vmatpush.bf16.msrb.mxu2 %v2264_v44  ;;  %v2501_v51 = vor.u32 %v2834_v48, %v2498_v50 }
  0x30   :  { %2257 = vmatmul.msk.f32.gmra.mxu3 %vm72_vm1, %v56_v63  ;;  %v2284_v22 = vor.u32 %v2780_v13, %v2281_v14  ;;  %2241 = vmatmul.msk.f32.gmra.mxu2 %vm72_vm1, %v57_v26  ;;  %v2514_v13 = vld [vmem:[#allocation3 + $0x1f8] sm:$0xf0] }
  0x31   :  { %v2517_v16 = vor.u32 %v2838_v11, %v2514_v13 }
  0x32   :  { %575 = vmatpush.bf16.msrb.mxu0 %v2284_v22  ;;  %v2441_v22 = vor.u32 %v2821_v20, %v2440_v19 }
  0x33   :  { %916 = vmatpush.bf16.msra.mxu2 %v2449_v61  ;;  %v2424_v61 = vld [vmem:[#allocation3 + $0x140] sm:$0xf] }
  0x36   :  { %2233 = vmatmul.msk.f32.gmra.mxu0 %vm72_vm1, %v49_v24 }
  0x37   :  { %2250 = vmatmul.msk.f32.gmra.mxu1 %vm72_vm1, %v49_v24  ;;  %v2345_v24 = vld [vmem:[#allocation3 + $0xa8] sm:$0xf0]  ;;  %576 = vmatpush.bf16.msrb.mxu0 %v2276_v40  ;;  %v2819_v40 = vld [vmem:[#allocation3 + $0x154] sm:$0xf0] }
  0x38   :  { %v2348_v33 = vor.u32 %v2796_v23, %v2345_v24  ;;  %2258 = vmatmul.msk.f32.gmra.mxu3 %vm72_vm1, %v57_v26  ;;  %2242 = vmatmul.msk.f32.gmra.mxu2 %vm72_vm1, %v58_v36  ;;  %v2837_v23 = vld [vmem:[#allocation3 + $0x1e4] sm:$0xf0]  ;;  %v2433_v42 = vor.u32 %v2819_v40, %v2432_v39 }
  0x39   :  { %v2505_v24 = vor.u32 %v2837_v23, %v2504_v21  ;;  %917 = vmatpush.bf16.msra.mxu2 %v2441_v22 }
  0x3a   :  { %624 = vmatpush.bf16.msrb.mxu1 %v2348_v33  ;;  %v2836_v33 = vld [vmem:[#allocation3 + $0x1e4] sm:$0xf] }
  0x3b   :  { %577 = vmatpush.bf16.msrb.mxu0 %v2268_v52  ;;  %v2509_v38 = vor.u32 %v2836_v33, %v2506_v35  ;;  %v2815_v33 = vld [vmem:[#allocation3 + $0x134] sm:$0xf0] }
  0x3c   :  { %v2417_v35 = vor.u32 %v2815_v33, %v2416_v32  ;;  %v2827_v33 = vld [vmem:[#allocation3 + $0x194] sm:$0xf0] }
  0x3d   :  { %918 = vmatpush.bf16.msra.mxu2 %v2433_v42  ;;  %v2482_v42 = vld [vmem:[#allocation3 + $0x1b8] sm:$0xf0] }
  0x3e   :  { %2234 = vmatmul.msk.f32.gmra.mxu0 %vm72_vm1, %v50_v62 }
  0x3f   :  { %2251 = vmatmul.msk.f32.gmra.mxu1 %vm72_vm1, %v50_v62  ;;  %v2839_v62 = vld [vmem:[#allocation3 + $0x1f4] sm:$0xf0]  ;;  %1014 = vmatpush.bf16.msra.mxu0 %v2453_v12 }
  0x40   :  { %2259 = vmatmul.msk.f32.gmra.mxu3 %vm72_vm1, %v58_v36  ;;  %2243 = vmatmul.msk.f32.gmra.mxu2 %vm72_vm1, %v59_v37  ;;  %v2513_v63 = vor.u32 %v2839_v62, %v2512_v59  ;;  %v2817_v62 = vld [vmem:[#allocation3 + $0x144] sm:$0xf0] }
  0x42   :  { %965 = vmatpush.bf16.msra.mxu3 %v2513_v63  ;;  %v2488_v63 = vld [vmem:[#allocation3 + $0x1c0] sm:$0xf] }
  0x43   :  { %1015 = vmatpush.bf16.msra.mxu0 %v2445_v34  ;;  %v2480_v34 = vld [vmem:[#allocation3 + $0x1b0] sm:$0xf] }
  0x46   :  { %2235 = vmatmul.msk.f32.gmra.mxu0 %vm72_vm1, %v51_v25  ;;  %966 = vmatpush.bf16.msra.mxu3 %v2505_v24 }
  0x47   :  { %2252 = vmatmul.msk.f32.gmra.mxu1 %vm72_vm1, %v51_v25 }
  0x48   :  { %2260 = vmatmul.msk.f32.gmra.mxu3 %vm72_vm1, %v59_v37 }
  0x4e   :  { %2236 = vmatmul.msk.f32.gmra.mxu0 %vm72_vm1, %v3027_v10  ;;  %v2337_v10 = vld [vmem:[#allocation3 + $0x98] sm:$0xf0] }
  0x4f   :  { %v2340_v47 = vor.u32 %v2794_v43, %v2337_v10  ;;  %v2835_v43 = vld [vmem:[#allocation3 + $0x1d4] sm:$0xf0] }
  0x50   :  { %v2497_v45 = vor.u32 %v2835_v43, %v2496_v41  ;;  %v2830_v41 = vld [vmem:[#allocation3 + $0x1b4] sm:$0xf] }
  0x51   :  { %625 = vmatpush.bf16.msrb.mxu1 %v2340_v47  ;;  %v2434_v47 = vld [vmem:[#allocation3 + $0x158] sm:$0xf0] }
  0x52   :  { %967 = vmatpush.bf16.msra.mxu3 %v2497_v45  ;;  %v2437_v49 = vor.u32 %v2818_v46, %v2434_v47 }
  0x54   :  { %1016 = vmatpush.bf16.msra.mxu0 %v2437_v49 }
  0x55   :  { %626 = vmatpush.bf16.msrb.mxu1 %v2332_v54 }
  0x59   :  { %1063 = vmatpush.bf16.msra.mxu1 %v2517_v16  ;;  %v2490_v16 = vld [vmem:[#allocation3 + $0x1c8] sm:$0xf0] }
  0x5d   :  { %1064 = vmatpush.bf16.msra.mxu1 %v2509_v38  ;;  %v2418_v38 = vld [vmem:[#allocation3 + $0x138] sm:$0xf0] }
  0x61   :  { %1065 = vmatpush.bf16.msra.mxu1 %v2501_v51 }
  0x8b   :  { %v145_v55 = vpop.f32.mrf.mxu0 }
  0x8c   :  { %v210_v56 = vpop.f32.mrf.mxu1  ;;  %v3101_v4 = vadd.f32 %v145_v55, %v3096_v0 }
  0x8d   :  { %v3104_v5 = vadd.f32 %v210_v56, %v3098_v1 }
  0x93   :  { %v148_v2 = vpop.f32.mrf.mxu0  ;;  %v234_v60 = vpop.f32.mrf.mxu3 }
  0x94   :  { %v213_v3 = vpop.f32.mrf.mxu1  ;;  %v3107_v6 = vadd.f32 %v148_v2, %v3096_v0  ;;  %v2425_v2 = vor.u32 %v2817_v62, %v2424_v61  ;;  %v3171_v48 = vadd.f32 %v234_v60, %v3098_v1  ;;  %v2472_v61 = vld [vmem:[#allocation3 + $0x1a0] sm:$0xf]  ;;  %v2829_v62 = vld [vmem:[#allocation3 + $0x1a4] sm:$0xf0] }
  0x95   :  { %v3110_v7 = vadd.f32 %v213_v3, %v3098_v1  ;;  %v2833_v3 = vld [vmem:[#allocation3 + $0x1c4] sm:$0xf0] }
  0x96   :  { %v258_v14 = vpack.c.bf16 %v3107_v6, %v3101_v4  ;;  %v2489_v13 = vor.u32 %v2833_v3, %v2488_v63  ;;  %919 = vmatpush.bf16.msra.mxu2 %v2425_v2  ;;  %v2812_v63 = vld [vmem:[#allocation3 + $0x124] sm:$0xf]  ;;  %v2410_v2 = vld [vmem:[#allocation3 + $0x128] sm:$0xf0]  ;;  %v2473_v3 = vor.u32 %v2829_v62, %v2472_v61  ;;  %v2392_v61 = vld [vmem:[#allocation3 + $0x100] sm:$0xf] }
  0x97   :  { %v259_v15 = vpack.c.bf16 %v3110_v7, %v3104_v5 }
  0x98   :  { %480 = vmatmul.bf16.vlgmr.msrb.gmra.mxu2 %v258_v14  ;;  %578 = vmatmul.bf16.vlgmr.msrb.gmra.mxu0 %v258_v14  ;;  %v2429_v14 = vor.u32 %v2816_v8, %v2426_v9  ;;  %v2413_v8 = vor.u32 %v2812_v63, %v2410_v2  ;;  %v2828_v9 = vld [vmem:[#allocation3 + $0x1a4] sm:$0xf]  ;;  %v2456_v2 = vld [vmem:[#allocation3 + $0x180] sm:$0xf] }
  0x99   :  { %529 = vmatmul.bf16.vlgmr.msrb.gmra.mxu3 %v259_v15  ;;  %627 = vmatmul.bf16.vlgmr.msrb.gmra.mxu1 %v259_v15  ;;  %v2832_v15 = vld [vmem:[#allocation3 + $0x1c4] sm:$0xf] }
  0x9a   :  { %968 = vmatpush.bf16.msra.mxu3 %v2489_v13  ;;  %1017 = vmatpush.bf16.msra.mxu0 %v2429_v14 }
  0x9b   :  { %v151_v17 = vpop.f32.mrf.mxu0  ;;  %v237_v19 = vpop.f32.mrf.mxu3  ;;  %920 = vmatpush.bf16.msra.mxu2 %v2417_v35  ;;  %v2402_v35 = vld [vmem:[#allocation3 + $0x118] sm:$0xf0] }
  0x9c   :  { %v216_v18 = vpop.f32.mrf.mxu1  ;;  %v3117_v27 = vadd.f32 %v151_v17, %v3096_v0  ;;  %v2493_v17 = vor.u32 %v2832_v15, %v2490_v16  ;;  %v3174_v49 = vadd.f32 %v237_v19, %v3098_v1 }
  0x9d   :  { %v3120_v28 = vadd.f32 %v216_v18, %v3098_v1  ;;  %v172_v18 = vpop.f32.mrf.mxu2 }
  0x9e   :  { %1066 = vmatpush.bf16.msra.mxu1 %v2493_v17  ;;  %v3165_v46 = vadd.f32 %v172_v18, %v3096_v0  ;;  %v267_v51 = vpack.c.bf16 %v3174_v49, %v3171_v48 }
  0xa3   :  { %v154_v25 = vpop.f32.mrf.mxu0  ;;  %v240_v45 = vpop.f32.mrf.mxu3 }
  0xa4   :  { %v219_v26 = vpop.f32.mrf.mxu1  ;;  %v3123_v29 = vadd.f32 %v154_v25, %v3096_v0  ;;  %v3184_v16 = vadd.f32 %v240_v45, %v3098_v1 }
  0xa5   :  { %v3126_v30 = vadd.f32 %v219_v26, %v3098_v1  ;;  %v175_v43 = vpop.f32.mrf.mxu2 }
  0xa6   :  { %v260_v36 = vpack.c.bf16 %v3123_v29, %v3117_v27  ;;  %v3181_v15 = vadd.f32 %v175_v43, %v3096_v0 }
  0xa7   :  { %v261_v37 = vpack.c.bf16 %v3126_v30, %v3120_v28 }
  0xa8   :  { %485 = vmatmul.bf16.gmra.mxu2 %v260_v36  ;;  %583 = vmatmul.bf16.gmra.mxu0 %v260_v36  ;;  %v2831_v36 = vld [vmem:[#allocation3 + $0x1b4] sm:$0xf0] }
  0xa9   :  { %534 = vmatmul.bf16.gmra.mxu3 %v261_v37  ;;  %632 = vmatmul.bf16.gmra.mxu1 %v261_v37  ;;  %v2814_v37 = vld [vmem:[#allocation3 + $0x134] sm:$0xf]  ;;  %v2481_v39 = vor.u32 %v2831_v36, %v2480_v34 }
  0xaa   :  { %v2421_v40 = vor.u32 %v2814_v37, %v2418_v38  ;;  %v2810_v34 = vld [vmem:[#allocation3 + $0x114] sm:$0xf] }
  0xab   :  { %v157_v44 = vpop.f32.mrf.mxu0  ;;  %969 = vmatpush.bf16.msra.mxu3 %v2481_v39  ;;  %v2405_v39 = vor.u32 %v2810_v34, %v2402_v35 }
  0xac   :  { %v222_v10 = vpop.f32.mrf.mxu1  ;;  %v3133_v54 = vadd.f32 %v157_v44, %v3096_v0  ;;  %v2485_v44 = vor.u32 %v2830_v41, %v2482_v42  ;;  %1018 = vmatpush.bf16.msra.mxu0 %v2421_v40 }
  0xad   :  { %v3136_v55 = vadd.f32 %v222_v10, %v3098_v1 }
  0xae   :  { %1067 = vmatpush.bf16.msra.mxu1 %v2485_v44 }
  0xaf   :  { %970 = vmatpush.bf16.msra.mxu3 %v2473_v3  ;;  %v2825_v3 = vld [vmem:[#allocation3 + $0x184] sm:$0xf0] }
  0xb0   :  { %1019 = vmatpush.bf16.msra.mxu0 %v2413_v8  ;;  %v2824_v8 = vld [vmem:[#allocation3 + $0x184] sm:$0xf] }
  0xb3   :  { %v160_v52 = vpop.f32.mrf.mxu0 }
  0xb4   :  { %v225_v53 = vpop.f32.mrf.mxu1  ;;  %v3139_v56 = vadd.f32 %v160_v52, %v3096_v0  ;;  %v178_v52 = vpop.f32.mrf.mxu2  ;;  %1020 = vmatpush.bf16.msra.mxu0 %v2405_v39 }
  0xb5   :  { %v3142_v57 = vadd.f32 %v225_v53, %v3098_v1  ;;  %v243_v53 = vpop.f32.mrf.mxu3  ;;  %v3187_v17 = vadd.f32 %v178_v52, %v3096_v0  ;;  %v2466_v52 = vld [vmem:[#allocation3 + $0x198] sm:$0xf0] }
  0xb6   :  { %v262_v58 = vpack.c.bf16 %v3139_v56, %v3133_v54  ;;  %v3190_v18 = vadd.f32 %v243_v53, %v3098_v1 }
  0xb7   :  { %v263_v59 = vpack.c.bf16 %v3142_v57, %v3136_v55  ;;  %v268_v19 = vpack.c.bf16 %v3187_v17, %v3181_v15 }
  0xb8   :  { %490 = vmatmul.bf16.gmra.mxu2 %v262_v58  ;;  %588 = vmatmul.bf16.gmra.mxu0 %v262_v58  ;;  %v2408_v58 = vld [vmem:[#allocation3 + $0x120] sm:$0xf] }
  0xb9   :  { %539 = vmatmul.bf16.gmra.mxu3 %v263_v59  ;;  %637 = vmatmul.bf16.gmra.mxu1 %v263_v59  ;;  %v2813_v59 = vld [vmem:[#allocation3 + $0x124] sm:$0xf0] }
  0xba   :  { %v2409_v60 = vor.u32 %v2813_v59, %v2408_v58 }
  0xbb   :  { %v163_v11 = vpop.f32.mrf.mxu0 }
  0xbc   :  { %v228_v12 = vpop.f32.mrf.mxu1  ;;  %v3149_v22 = vadd.f32 %v163_v11, %v3096_v0  ;;  %v2474_v11 = vld [vmem:[#allocation3 + $0x1a8] sm:$0xf0]  ;;  %921 = vmatpush.bf16.msra.mxu2 %v2409_v60  ;;  %v181_v13 = vpop.f32.mrf.mxu2  ;;  %v2809_v60 = vld [vmem:[#allocation3 + $0x104] sm:$0xf0] }
  0xbd   :  { %v3152_v23 = vadd.f32 %v228_v12, %v3098_v1  ;;  %v2477_v12 = vor.u32 %v2828_v9, %v2474_v11  ;;  %v246_v14 = vpop.f32.mrf.mxu3  ;;  %v3197_v40 = vadd.f32 %v181_v13, %v3096_v0  ;;  %v2393_v63 = vor.u32 %v2809_v60, %v2392_v61  ;;  %v2577_v61 = vld [vmem:[#allocation3 + $0x270] sm:$0xf]  ;;  %v2855_v60 = vld [vmem:[#allocation3 + $0x274] sm:$0xf0] }
  0xbe   :  { %v3200_v41 = vadd.f32 %v246_v14, %v3098_v1  ;;  %v2457_v13 = vor.u32 %v2825_v3, %v2456_v2  ;;  %v2458_v14 = vld [vmem:[#allocation3 + $0x188] sm:$0xf0] }
  0xbf   :  { %1068 = vmatpush.bf16.msra.mxu1 %v2477_v12 }
  0xc3   :  { %v166_v20 = vpop.f32.mrf.mxu0 }
  0xc4   :  { %v231_v21 = vpop.f32.mrf.mxu1  ;;  %v3155_v24 = vadd.f32 %v166_v20, %v3096_v0  ;;  %v269_v20 = vpack.c.bf16 %v3190_v18, %v3184_v16  ;;  %v184_v36 = vpop.f32.mrf.mxu2 }
  0xc5   :  { %v3158_v25 = vadd.f32 %v231_v21, %v3098_v1  ;;  %v2400_v21 = vld [vmem:[#allocation3 + $0x110] sm:$0xf]  ;;  %v249_v37 = vpop.f32.mrf.mxu3  ;;  %v3203_v42 = vadd.f32 %v184_v36, %v3096_v0 }
  0xc6   :  { %v264_v26 = vpack.c.bf16 %v3155_v24, %v3149_v22  ;;  %v3206_v43 = vadd.f32 %v249_v37, %v3098_v1 }
  0xc7   :  { %v265_v31 = vpack.c.bf16 %v3158_v25, %v3152_v23  ;;  %v270_v45 = vpack.c.bf16 %v3203_v42, %v3197_v40 }
  0xc8   :  { %495 = vmatmul.bf16.gmra.mxu2 %v264_v26  ;;  %593 = vmatmul.bf16.gmra.mxu0 %v264_v26  ;;  %v2811_v26 = vld [vmem:[#allocation3 + $0x114] sm:$0xf0] }
  0xc9   :  { %544 = vmatmul.bf16.gmra.mxu3 %v265_v31  ;;  %642 = vmatmul.bf16.gmra.mxu1 %v265_v31  ;;  %v2464_v31 = vld [vmem:[#allocation3 + $0x190] sm:$0xf]  ;;  %v2401_v32 = vor.u32 %v2811_v26, %v2400_v21  ;;  %v2808_v26 = vld [vmem:[#allocation3 + $0x104] sm:$0xf] }
  0xca   :  { %v2465_v38 = vor.u32 %v2827_v33, %v2464_v31  ;;  %v2394_v31 = vld [vmem:[#allocation3 + $0x108] sm:$0xf0] }
  0xcb   :  { %v169_v10 = vpop.f32.mrf.mxu0  ;;  %922 = vmatpush.bf16.msra.mxu2 %v2401_v32 }
  0xcc   :  { %v3168_v47 = vadd.f32 %v169_v10, %v3096_v0  ;;  %971 = vmatpush.bf16.msra.mxu3 %v2465_v38  ;;  %v187_v44 = vpop.f32.mrf.mxu2 }
  0xcd   :  { %v252_v10 = vpop.f32.mrf.mxu3  ;;  %v3213_v62 = vadd.f32 %v187_v44, %v3096_v0 }
  0xce   :  { %v266_v50 = vpack.c.bf16 %v3165_v46, %v3168_v47  ;;  %v3216_v9 = vadd.f32 %v252_v10, %v3098_v1 }
  0xcf   :  { %923 = vmatpush.bf16.msra.mxu2 %v2393_v63  ;;  %v2641_v63 = vld [vmem:[#allocation3 + $0x2f0] sm:$0xf] }
  0xd0   :  { %972 = vmatpush.bf16.msra.mxu3 %v2457_v13  ;;  %v2871_v13 = vld [vmem:[#allocation3 + $0x2f4] sm:$0xf0] }
  0xd4   :  { %v190_v58 = vpop.f32.mrf.mxu2 }
  0xd5   :  { %v255_v59 = vpop.f32.mrf.mxu3  ;;  %v3219_v11 = vadd.f32 %v190_v58, %v3096_v0  ;;  %v2397_v0 = vor.u32 %v2808_v26, %v2394_v31 }
  0xd6   :  { %v3222_v12 = vadd.f32 %v255_v59, %v3098_v1  ;;  %v306_v1 = vld [vmem:[%s3601_s4] sm:$0x3] }
  0xd7   :  { %1021 = vmatpush.bf16.msra.mxu0 %v2397_v0  ;;  %v3231_v34 = vperm.slane %v306_v1, 1  ;;  %v3234_v38 = vperm.slane %v306_v1, 0 }
  0xd8   :  { %500 = vmatmul.bf16.gmra.mxu2 %v266_v50  ;;  %598 = vmatmul.bf16.gmra.mxu0 %v266_v50  ;;  %v271_v50 = vpack.c.bf16 %v3206_v43, %v3200_v41  ;;  %v273_v21 = vpack.c.bf16 %v3222_v12, %v3216_v9 }
  0xd9   :  { %549 = vmatmul.bf16.gmra.mxu3 %v267_v51  ;;  %647 = vmatmul.bf16.gmra.mxu1 %v267_v51  ;;  %v2826_v51 = vld [vmem:[#allocation3 + $0x194] sm:$0xf] }
  0xda   :  { %v2469_v53 = vor.u32 %v2826_v51, %v2466_v52 }
  0xdc   :  { %1069 = vmatpush.bf16.msra.mxu1 %v2469_v53 }
  0xe8   :  { %505 = vmatmul.bf16.gmra.mxu2 %v268_v19  ;;  %603 = vmatmul.bf16.gmra.mxu0 %v268_v19  ;;  %v2461_v19 = vor.u32 %v2824_v8, %v2458_v14  ;;  %v2578_v8 = vor.u32 %v2855_v60, %v2577_v61 }
  0xe9   :  { %554 = vmatmul.bf16.gmra.mxu3 %v269_v20  ;;  %652 = vmatmul.bf16.gmra.mxu1 %v269_v20  ;;  %v272_v20 = vpack.c.bf16 %v3219_v11, %v3213_v62 }
  0xea   :  { %1070 = vmatpush.bf16.msra.mxu1 %v2461_v19  ;;  %v2642_v19 = vor.u32 %v2871_v13, %v2641_v63  ;;  %1360 = vmatpush.bf16.msrb.mxu2 %v2578_v8  ;;  %v2853_v8 = vld [vmem:[#allocation3 + $0x264] sm:$0xf0]  ;;  %v2633_v13 = vld [vmem:[#allocation3 + $0x2e0] sm:$0xf] }
  0xec   :  { %1409 = vmatpush.bf16.msrb.mxu3 %v2642_v19 }
  0xf8   :  { %510 = vmatmul.bf16.gmra.mxu2 %v270_v45  ;;  %608 = vmatmul.bf16.gmra.mxu0 %v270_v45 }
  0xf9   :  { %559 = vmatmul.bf16.gmra.mxu3 %v271_v50  ;;  %657 = vmatmul.bf16.gmra.mxu1 %v271_v50 }
 0x108   :  { %515 = vmatmul.bf16.gmra.mxu2 %v272_v20  ;;  %613 = vmatmul.bf16.gmra.mxu0 %v272_v20 }
 0x109   :  { %564 = vmatmul.bf16.gmra.mxu3 %v273_v21  ;;  %662 = vmatmul.bf16.gmra.mxu1 %v273_v21 }
 0x115   :  { %v579_v32 = vpop.f32.mrf.mxu0 }
 0x116   :  { %v628_v33 = vpop.f32.mrf.mxu1  ;;  %v580_v35 = vadd.f32 %v579_v32, %v3231_v34 }
 0x118   :  { %v629_v10 = vadd.f32 %v628_v33, %v580_v35 }
 0x11a   :  { %v669_v52 = vmul.f32 %v629_v10, %v3104_v5  ;;  %v2643_v10 = vld [vmem:[#allocation3 + $0x2f8] sm:$0xf0] }
 0x11b   :  { %v481_v36 = vpop.f32.mrf.mxu2 }
 0x11c   :  { %v530_v37 = vpop.f32.mrf.mxu3  ;;  %v482_v50 = vadd.f32 %v481_v36, %v3234_v38  ;;  %v2854_v36 = vld [vmem:[#allocation3 + $0x274] sm:$0xf] }
 0x11d   :  { %v581_v39 = vpop.f32.mrf.mxu0 }
 0x11e   :  { %v630_v44 = vpop.f32.mrf.mxu1  ;;  %v582_v45 = vadd.f32 %v581_v39, %v3231_v34  ;;  %v531_v2 = vadd.f32 %v530_v37, %v482_v50  ;;  %v2579_v37 = vld [vmem:[#allocation3 + $0x278] sm:$0xf0]  ;;  %v2870_v39 = vld [vmem:[#allocation3 + $0x2f4] sm:$0xf] }
 0x120   :  { %v631_v51 = vadd.f32 %v630_v44, %v582_v45  ;;  %v668_v31 = vmul.f32 %v531_v2, %v3101_v4  ;;  %v2582_v44 = vor.u32 %v2854_v36, %v2579_v37  ;;  %v2646_v45 = vor.u32 %v2870_v39, %v2643_v10  ;;  %v2852_v10 = vld [vmem:[#allocation3 + $0x264] sm:$0xf] }
 0x122   :  { %v671_v53 = vmul.f32 %v631_v51, %v3110_v7  ;;  %1458 = vmatpush.bf16.msrb.mxu0 %v2582_v44  ;;  %1507 = vmatpush.bf16.msrb.mxu1 %v2646_v45  ;;  %v2571_v45 = vld [vmem:[#allocation3 + $0x268] sm:$0xf0] }
 0x123   :  { %v483_v58 = vpop.f32.mrf.mxu2 }
 0x124   :  { %v532_v59 = vpop.f32.mrf.mxu3  ;;  %v484_v3 = vadd.f32 %v483_v58, %v3234_v38  ;;  %v701_v14 = vpack.c.bf16 %v671_v53, %v669_v52 }
 0x125   :  { %v584_v21 = vpop.f32.mrf.mxu0 }
 0x126   :  { %v533_v20 = vadd.f32 %v532_v59, %v484_v3  ;;  %v633_v26 = vpop.f32.mrf.mxu1  ;;  %973 = vmatmul.bf16.vlgmr.msra.gmra.mxu3 %v701_v14  ;;  %1071 = vmatmul.bf16.vlgmr.msra.gmra.mxu1 %v701_v14  ;;  %v585_v32 = vadd.f32 %v584_v21, %v3231_v34  ;;  %v2569_v3 = vld [vmem:[#allocation3 + $0x260] sm:$0xf]  ;;  %v2869_v21 = vld [vmem:[#allocation3 + $0x2e4] sm:$0xf0] }
 0x128   :  { %v670_v0 = vmul.f32 %v533_v20, %v3107_v6  ;;  %v634_v52 = vadd.f32 %v633_v26, %v585_v32  ;;  %v2570_v20 = vor.u32 %v2853_v8, %v2569_v3 }
 0x12a   :  { %v700_v1 = vpack.c.bf16 %v670_v0, %v668_v31  ;;  %v673_v61 = vmul.f32 %v634_v52, %v3120_v28  ;;  %v2634_v31 = vor.u32 %v2869_v21, %v2633_v13  ;;  %1361 = vmatpush.bf16.msrb.mxu2 %v2570_v20  ;;  %v2635_v52 = vld [vmem:[#allocation3 + $0x2e8] sm:$0xf0]  ;;  %v2851_v20 = vld [vmem:[#allocation3 + $0x254] sm:$0xf0]  ;;  %v2625_v21 = vld [vmem:[#allocation3 + $0x2d0] sm:$0xf] }
 0x12b   :  { %v486_v33 = vpop.f32.mrf.mxu2 }
 0x12c   :  { %v535_v35 = vpop.f32.mrf.mxu3  ;;  %924 = vmatmul.bf16.vlgmr.msra.gmra.mxu2 %v700_v1  ;;  %1022 = vmatmul.bf16.vlgmr.msra.gmra.mxu0 %v700_v1  ;;  %v487_v58 = vadd.f32 %v486_v33, %v3234_v38 }
 0x12d   :  { %v586_v50 = vpop.f32.mrf.mxu0  ;;  %1410 = vmatpush.bf16.msrb.mxu3 %v2634_v31 }
 0x12e   :  { %v635_v51 = vpop.f32.mrf.mxu1  ;;  %v587_v53 = vadd.f32 %v586_v50, %v3231_v34  ;;  %v536_v14 = vadd.f32 %v535_v35, %v487_v58  ;;  %v2868_v50 = vld [vmem:[#allocation3 + $0x2e4] sm:$0xf] }
 0x130   :  { %v636_v59 = vadd.f32 %v635_v51, %v587_v53  ;;  %v672_v33 = vmul.f32 %v536_v14, %v3117_v27  ;;  %v2574_v51 = vor.u32 %v2852_v10, %v2571_v45  ;;  %v2638_v53 = vor.u32 %v2868_v50, %v2635_v52  ;;  %v2850_v52 = vld [vmem:[#allocation3 + $0x254] sm:$0xf] }
 0x132   :  { %v675_v60 = vmul.f32 %v636_v59, %v3126_v30  ;;  %1459 = vmatpush.bf16.msrb.mxu0 %v2574_v51  ;;  %1508 = vmatpush.bf16.msrb.mxu1 %v2638_v53  ;;  %v2563_v53 = vld [vmem:[#allocation3 + $0x258] sm:$0xf0] }
 0x133   :  { %v488_v63 = vpop.f32.mrf.mxu2 }
 0x134   :  { %v537_v2 = vpop.f32.mrf.mxu3  ;;  %v489_v19 = vadd.f32 %v488_v63, %v3234_v38  ;;  %v703_v26 = vpack.c.bf16 %v675_v60, %v673_v61 }
 0x135   :  { %v589_v1 = vpop.f32.mrf.mxu0 }
 0x136   :  { %v538_v0 = vadd.f32 %v537_v2, %v489_v19  ;;  %v638_v32 = vpop.f32.mrf.mxu1  ;;  %978 = vmatmul.bf16.gmra.mxu3 %v703_v26  ;;  %1076 = vmatmul.bf16.gmra.mxu1 %v703_v26  ;;  %v590_v35 = vadd.f32 %v589_v1, %v3231_v34  ;;  %v2561_v19 = vld [vmem:[#allocation3 + $0x250] sm:$0xf]  ;;  %v2867_v1 = vld [vmem:[#allocation3 + $0x2d4] sm:$0xf0] }
 0x138   :  { %v674_v36 = vmul.f32 %v538_v0, %v3123_v29  ;;  %v639_v61 = vadd.f32 %v638_v32, %v590_v35  ;;  %v2562_v0 = vor.u32 %v2851_v20, %v2561_v19 }
 0x13a   :  { %v702_v37 = vpack.c.bf16 %v674_v36, %v672_v33  ;;  %v677_v3 = vmul.f32 %v639_v61, %v3136_v55  ;;  %v2626_v33 = vor.u32 %v2867_v1, %v2625_v21  ;;  %1362 = vmatpush.bf16.msrb.mxu2 %v2562_v0  ;;  %v2627_v61 = vld [vmem:[#allocation3 + $0x2d8] sm:$0xf0]  ;;  %v2849_v0 = vld [vmem:[#allocation3 + $0x244] sm:$0xf0]  ;;  %v2617_v1 = vld [vmem:[#allocation3 + $0x2c0] sm:$0xf] }
 0x13b   :  { %v491_v39 = vpop.f32.mrf.mxu2 }
 0x13c   :  { %v540_v44 = vpop.f32.mrf.mxu3  ;;  %929 = vmatmul.bf16.gmra.mxu2 %v702_v37  ;;  %1027 = vmatmul.bf16.gmra.mxu0 %v702_v37  ;;  %v492_v63 = vadd.f32 %v491_v39, %v3234_v38 }
 0x13d   :  { %v591_v58 = vpop.f32.mrf.mxu0  ;;  %1411 = vmatpush.bf16.msrb.mxu3 %v2626_v33 }
 0x13e   :  { %v640_v59 = vpop.f32.mrf.mxu1  ;;  %v592_v60 = vadd.f32 %v591_v58, %v3231_v34  ;;  %v541_v26 = vadd.f32 %v540_v44, %v492_v63  ;;  %v2866_v58 = vld [vmem:[#allocation3 + $0x2d4] sm:$0xf] }
 0x140   :  { %v641_v2 = vadd.f32 %v640_v59, %v592_v60  ;;  %v676_v39 = vmul.f32 %v541_v26, %v3133_v54  ;;  %v2566_v59 = vor.u32 %v2850_v52, %v2563_v53  ;;  %v2630_v60 = vor.u32 %v2866_v58, %v2627_v61  ;;  %v2848_v61 = vld [vmem:[#allocation3 + $0x244] sm:$0xf] }
 0x142   :  { %v679_v8 = vmul.f32 %v641_v2, %v3142_v57  ;;  %1460 = vmatpush.bf16.msrb.mxu0 %v2566_v59  ;;  %1509 = vmatpush.bf16.msrb.mxu1 %v2630_v60  ;;  %v2555_v60 = vld [vmem:[#allocation3 + $0x248] sm:$0xf0] }
 0x143   :  { %v493_v13 = vpop.f32.mrf.mxu2 }
 0x144   :  { %v542_v14 = vpop.f32.mrf.mxu3  ;;  %v494_v31 = vadd.f32 %v493_v13, %v3234_v38  ;;  %v705_v32 = vpack.c.bf16 %v679_v8, %v677_v3 }
 0x145   :  { %v594_v37 = vpop.f32.mrf.mxu0 }
 0x146   :  { %v543_v36 = vadd.f32 %v542_v14, %v494_v31  ;;  %v643_v35 = vpop.f32.mrf.mxu1  ;;  %983 = vmatmul.bf16.gmra.mxu3 %v705_v32  ;;  %1081 = vmatmul.bf16.gmra.mxu1 %v705_v32  ;;  %v595_v44 = vadd.f32 %v594_v37, %v3231_v34  ;;  %v2553_v31 = vld [vmem:[#allocation3 + $0x240] sm:$0xf]  ;;  %v2865_v37 = vld [vmem:[#allocation3 + $0x2c4] sm:$0xf0] }
 0x148   :  { %v678_v10 = vmul.f32 %v543_v36, %v3139_v56  ;;  %v644_v3 = vadd.f32 %v643_v35, %v595_v44  ;;  %v2554_v36 = vor.u32 %v2849_v0, %v2553_v31 }
 0x14a   :  { %v704_v45 = vpack.c.bf16 %v678_v10, %v676_v39  ;;  %v681_v19 = vmul.f32 %v644_v3, %v3152_v23  ;;  %v2618_v39 = vor.u32 %v2865_v37, %v2617_v1  ;;  %1363 = vmatpush.bf16.msrb.mxu2 %v2554_v36  ;;  %v2619_v3 = vld [vmem:[#allocation3 + $0x2c8] sm:$0xf0]  ;;  %v2847_v36 = vld [vmem:[#allocation3 + $0x234] sm:$0xf0]  ;;  %v2609_v37 = vld [vmem:[#allocation3 + $0x2b0] sm:$0xf] }
 0x14b   :  { %v496_v50 = vpop.f32.mrf.mxu2 }
 0x14c   :  { %v545_v51 = vpop.f32.mrf.mxu3  ;;  %934 = vmatmul.bf16.gmra.mxu2 %v704_v45  ;;  %1032 = vmatmul.bf16.gmra.mxu0 %v704_v45  ;;  %v497_v13 = vadd.f32 %v496_v50, %v3234_v38 }
 0x14d   :  { %v596_v63 = vpop.f32.mrf.mxu0  ;;  %1412 = vmatpush.bf16.msrb.mxu3 %v2618_v39 }
 0x14e   :  { %v645_v2 = vpop.f32.mrf.mxu1  ;;  %v597_v8 = vadd.f32 %v596_v63, %v3231_v34  ;;  %v546_v32 = vadd.f32 %v545_v51, %v497_v13  ;;  %v2864_v63 = vld [vmem:[#allocation3 + $0x2c4] sm:$0xf] }
 0x150   :  { %v646_v14 = vadd.f32 %v645_v2, %v597_v8  ;;  %v680_v50 = vmul.f32 %v546_v32, %v3149_v22  ;;  %v2558_v2 = vor.u32 %v2848_v61, %v2555_v60  ;;  %v2622_v8 = vor.u32 %v2864_v63, %v2619_v3  ;;  %v2846_v3 = vld [vmem:[#allocation3 + $0x234] sm:$0xf] }
 0x152   :  { %v683_v20 = vmul.f32 %v646_v14, %v3158_v25  ;;  %1461 = vmatpush.bf16.msrb.mxu0 %v2558_v2  ;;  %1510 = vmatpush.bf16.msrb.mxu1 %v2622_v8  ;;  %v2547_v8 = vld [vmem:[#allocation3 + $0x238] sm:$0xf0] }
 0x153   :  { %v498_v21 = vpop.f32.mrf.mxu2 }
 0x154   :  { %v547_v26 = vpop.f32.mrf.mxu3  ;;  %v499_v33 = vadd.f32 %v498_v21, %v3234_v38  ;;  %v707_v35 = vpack.c.bf16 %v683_v20, %v681_v19 }
 0x155   :  { %v599_v45 = vpop.f32.mrf.mxu0 }
 0x156   :  { %v548_v10 = vadd.f32 %v547_v26, %v499_v33  ;;  %v648_v44 = vpop.f32.mrf.mxu1  ;;  %988 = vmatmul.bf16.gmra.mxu3 %v707_v35  ;;  %1086 = vmatmul.bf16.gmra.mxu1 %v707_v35  ;;  %v600_v51 = vadd.f32 %v599_v45, %v3231_v34  ;;  %v2545_v33 = vld [vmem:[#allocation3 + $0x230] sm:$0xf]  ;;  %v2863_v45 = vld [vmem:[#allocation3 + $0x2b4] sm:$0xf0] }
 0x158   :  { %v682_v52 = vmul.f32 %v548_v10, %v3155_v24  ;;  %v649_v19 = vadd.f32 %v648_v44, %v600_v51  ;;  %v2546_v10 = vor.u32 %v2847_v36, %v2545_v33 }
 0x15a   :  { %v706_v53 = vpack.c.bf16 %v682_v52, %v680_v50  ;;  %v685_v31 = vmul.f32 %v649_v19, %v3171_v48  ;;  %v2610_v50 = vor.u32 %v2863_v45, %v2609_v37  ;;  %1364 = vmatpush.bf16.msrb.mxu2 %v2546_v10  ;;  %v2611_v19 = vld [vmem:[#allocation3 + $0x2b8] sm:$0xf0]  ;;  %v2845_v10 = vld [vmem:[#allocation3 + $0x224] sm:$0xf0]  ;;  %v2601_v45 = vld [vmem:[#allocation3 + $0x2a0] sm:$0xf] }
 0x15b   :  { %v501_v58 = vpop.f32.mrf.mxu2 }
 0x15c   :  { %v550_v59 = vpop.f32.mrf.mxu3  ;;  %939 = vmatmul.bf16.gmra.mxu2 %v706_v53  ;;  %1037 = vmatmul.bf16.gmra.mxu0 %v706_v53  ;;  %v502_v21 = vadd.f32 %v501_v58, %v3234_v38 }
 0x15d   :  { %v601_v13 = vpop.f32.mrf.mxu0  ;;  %1413 = vmatpush.bf16.msrb.mxu3 %v2610_v50 }
 0x15e   :  { %v650_v14 = vpop.f32.mrf.mxu1  ;;  %v602_v20 = vadd.f32 %v601_v13, %v3231_v34  ;;  %v551_v35 = vadd.f32 %v550_v59, %v502_v21  ;;  %v2862_v13 = vld [vmem:[#allocation3 + $0x2b4] sm:$0xf] }
 0x160   :  { %v651_v26 = vadd.f32 %v650_v14, %v602_v20  ;;  %v684_v58 = vmul.f32 %v551_v35, %v3168_v47  ;;  %v2550_v14 = vor.u32 %v2846_v3, %v2547_v8  ;;  %v2614_v20 = vor.u32 %v2862_v13, %v2611_v19  ;;  %v2844_v8 = vld [vmem:[#allocation3 + $0x224] sm:$0xf]  ;;  %v2539_v13 = vld [vmem:[#allocation3 + $0x228] sm:$0xf0] }
 0x161   :  { %v2603_v19 = vld [vmem:[#allocation3 + $0x2a8] sm:$0xf0] }
 0x162   :  { %v687_v0 = vmul.f32 %v651_v26, %v3174_v49  ;;  %1462 = vmatpush.bf16.msrb.mxu0 %v2550_v14  ;;  %1511 = vmatpush.bf16.msrb.mxu1 %v2614_v20  ;;  %v2542_v14 = vor.u32 %v2844_v8, %v2539_v13  ;;  %v2531_v8 = vld [vmem:[#allocation3 + $0x218] sm:$0xf0] }
 0x163   :  { %v503_v1 = vpop.f32.mrf.mxu2 }
 0x164   :  { %v552_v32 = vpop.f32.mrf.mxu3  ;;  %v504_v39 = vadd.f32 %v503_v1, %v3234_v38  ;;  %v709_v44 = vpack.c.bf16 %v687_v0, %v685_v31 }
 0x165   :  { %v604_v53 = vpop.f32.mrf.mxu0 }
 0x166   :  { %v553_v52 = vadd.f32 %v552_v32, %v504_v39  ;;  %v653_v51 = vpop.f32.mrf.mxu1  ;;  %993 = vmatmul.bf16.gmra.mxu3 %v709_v44  ;;  %1091 = vmatmul.bf16.gmra.mxu1 %v709_v44  ;;  %v605_v59 = vadd.f32 %v604_v53, %v3231_v34  ;;  %v2537_v39 = vld [vmem:[#allocation3 + $0x220] sm:$0xf]  ;;  %v2861_v53 = vld [vmem:[#allocation3 + $0x2a4] sm:$0xf0] }
 0x167   :  { %1463 = vmatpush.bf16.msrb.mxu0 %v2542_v14 }
 0x168   :  { %v686_v61 = vmul.f32 %v553_v52, %v3165_v46  ;;  %v654_v31 = vadd.f32 %v653_v51, %v605_v59  ;;  %v2538_v52 = vor.u32 %v2845_v10, %v2537_v39 }
 0x16a   :  { %v708_v60 = vpack.c.bf16 %v686_v61, %v684_v58  ;;  %v689_v33 = vmul.f32 %v654_v31, %v3184_v16  ;;  %v2602_v58 = vor.u32 %v2861_v53, %v2601_v45  ;;  %1365 = vmatpush.bf16.msrb.mxu2 %v2538_v52 }
 0x16b   :  { %v506_v63 = vpop.f32.mrf.mxu2 }
 0x16c   :  { %v555_v2 = vpop.f32.mrf.mxu3  ;;  %944 = vmatmul.bf16.gmra.mxu2 %v708_v60  ;;  %1042 = vmatmul.bf16.gmra.mxu0 %v708_v60  ;;  %v507_v1 = vadd.f32 %v506_v63, %v3234_v38 }
 0x16d   :  { %v606_v21 = vpop.f32.mrf.mxu0  ;;  %1414 = vmatpush.bf16.msrb.mxu3 %v2602_v58 }
 0x16e   :  { %v655_v26 = vpop.f32.mrf.mxu1  ;;  %v607_v0 = vadd.f32 %v606_v21, %v3231_v34  ;;  %v556_v44 = vadd.f32 %v555_v2, %v507_v1  ;;  %v2860_v2 = vld [vmem:[#allocation3 + $0x2a4] sm:$0xf]  ;;  %v2529_v1 = vld [vmem:[#allocation3 + $0x210] sm:$0xf] }
 0x16f   :  { %v2606_v21 = vor.u32 %v2860_v2, %v2603_v19 }
 0x170   :  { %v656_v32 = vadd.f32 %v655_v26, %v607_v0  ;;  %v688_v63 = vmul.f32 %v556_v44, %v3181_v15 }
 0x171   :  { %1512 = vmatpush.bf16.msrb.mxu1 %v2606_v21 }
 0x172   :  { %v691_v36 = vmul.f32 %v656_v32, %v3190_v18  ;;  %v2843_v32 = vld [vmem:[#allocation3 + $0x214] sm:$0xf0] }
 0x173   :  { %v508_v37 = vpop.f32.mrf.mxu2 }
 0x174   :  { %v557_v35 = vpop.f32.mrf.mxu3  ;;  %v509_v50 = vadd.f32 %v508_v37, %v3234_v38  ;;  %v711_v51 = vpack.c.bf16 %v691_v36, %v689_v33  ;;  %v2593_v33 = vld [vmem:[#allocation3 + $0x290] sm:$0xf]  ;;  %v2530_v36 = vor.u32 %v2843_v32, %v2529_v1  ;;  %v2859_v37 = vld [vmem:[#allocation3 + $0x294] sm:$0xf0] }
 0x175   :  { %v609_v60 = vpop.f32.mrf.mxu0  ;;  %v2594_v10 = vor.u32 %v2859_v37, %v2593_v33  ;;  %v2858_v33 = vld [vmem:[#allocation3 + $0x294] sm:$0xf] }
 0x176   :  { %v558_v61 = vadd.f32 %v557_v35, %v509_v50  ;;  %v658_v59 = vpop.f32.mrf.mxu1  ;;  %998 = vmatmul.bf16.gmra.mxu3 %v711_v51  ;;  %1096 = vmatmul.bf16.gmra.mxu1 %v711_v51  ;;  %v610_v26 = vadd.f32 %v609_v60, %v3231_v34 }
 0x177   :  { %1366 = vmatpush.bf16.msrb.mxu2 %v2530_v36  ;;  %1415 = vmatpush.bf16.msrb.mxu3 %v2594_v10  ;;  %v2595_v36 = vld [vmem:[#allocation3 + $0x298] sm:$0xf0] }
 0x178   :  { %v690_v3 = vmul.f32 %v558_v61, %v3187_v17  ;;  %v659_v45 = vadd.f32 %v658_v59, %v610_v26 }
 0x17a   :  { %v710_v20 = vpack.c.bf16 %v690_v3, %v688_v63  ;;  %v693_v53 = vmul.f32 %v659_v45, %v3200_v41  ;;  %v2842_v3 = vld [vmem:[#allocation3 + $0x214] sm:$0xf] }
 0x17b   :  { %v511_v31 = vpop.f32.mrf.mxu2  ;;  %v2534_v59 = vor.u32 %v2842_v3, %v2531_v8 }
 0x17c   :  { %v560_v0 = vpop.f32.mrf.mxu3  ;;  %949 = vmatmul.bf16.gmra.mxu2 %v710_v20  ;;  %1047 = vmatmul.bf16.gmra.mxu0 %v710_v20  ;;  %v512_v50 = vadd.f32 %v511_v31, %v3234_v38 }
 0x17d   :  { %v611_v35 = vpop.f32.mrf.mxu0  ;;  %1464 = vmatpush.bf16.msrb.mxu0 %v2534_v59  ;;  %v2856_v59 = vld [vmem:[#allocation3 + $0x284] sm:$0xf] }
 0x17e   :  { %v660_v39 = vpop.f32.mrf.mxu1  ;;  %v612_v44 = vadd.f32 %v611_v35, %v3231_v34  ;;  %v561_v60 = vadd.f32 %v560_v0, %v512_v50 }
 0x180   :  { %v661_v52 = vadd.f32 %v660_v39, %v612_v44  ;;  %v692_v20 = vmul.f32 %v561_v60, %v3197_v40  ;;  %v2598_v39 = vor.u32 %v2858_v33, %v2595_v36  ;;  %v2841_v60 = vld [vmem:[#allocation3 + $0x204] sm:$0xf0]  ;;  %v2389_v33 = vld [vmem:[%s3601_s4 + $0x2] sm:$0x3] }
 0x182   :  { %v695_v51 = vmul.f32 %v661_v52, %v3206_v43  ;;  %1513 = vmatpush.bf16.msrb.mxu1 %v2598_v39 }
 0x183   :  { %v513_v58 = vpop.f32.mrf.mxu2 }
 0x184   :  { %v562_v61 = vpop.f32.mrf.mxu3  ;;  %v514_v63 = vadd.f32 %v513_v58, %v3234_v38  ;;  %v713_v13 = vpack.c.bf16 %v695_v51, %v693_v53 }
 0x185   :  { %v614_v14 = vpop.f32.mrf.mxu0 }
 0x186   :  { %v563_v2 = vadd.f32 %v562_v61, %v514_v63  ;;  %v663_v19 = vpop.f32.mrf.mxu1  ;;  %1003 = vmatmul.bf16.gmra.mxu3 %v713_v13  ;;  %1101 = vmatmul.bf16.gmra.mxu1 %v713_v13  ;;  %v615_v31 = vadd.f32 %v614_v14, %v3231_v34  ;;  %v2521_v61 = vld [vmem:[#allocation3 + $0x200] sm:$0xf]  ;;  %v2857_v13 = vld [vmem:[#allocation3 + $0x284] sm:$0xf0] }
 0x187   :  { %v2522_v8 = vor.u32 %v2841_v60, %v2521_v61 }
 0x188   :  { %v694_v21 = vmul.f32 %v563_v2, %v3203_v42  ;;  %v664_v37 = vadd.f32 %v663_v19, %v615_v31  ;;  %v2587_v19 = vld [vmem:[#allocation3 + $0x288] sm:$0xf0]  ;;  %v2840_v31 = vld [vmem:[#allocation3 + $0x204] sm:$0xf] }
 0x189   :  { %1367 = vmatpush.bf16.msrb.mxu2 %v2522_v8  ;;  %v2706_v8 = vld [vmem:[#allocation3 + $0x370] sm:$0xf] }
 0x18a   :  { %v712_v26 = vpack.c.bf16 %v694_v21, %v692_v20  ;;  %v697_v50 = vmul.f32 %v664_v37, %v3216_v9  ;;  %v2590_v20 = vor.u32 %v2856_v59, %v2587_v19 }
 0x18b   :  { %v516_v0 = vpop.f32.mrf.mxu2 }
 0x18c   :  { %v565_v1 = vpop.f32.mrf.mxu3  ;;  %954 = vmatmul.bf16.gmra.mxu2 %v712_v26  ;;  %1052 = vmatmul.bf16.gmra.mxu0 %v712_v26  ;;  %v517_v10 = vadd.f32 %v516_v0, %v3234_v38  ;;  %v2523_v0 = vld [vmem:[#allocation3 + $0x208] sm:$0xf0] }
 0x18d   :  { %v616_v32 = vpop.f32.mrf.mxu0  ;;  %1514 = vmatpush.bf16.msrb.mxu1 %v2590_v20 }
 0x18e   :  { %v617_v35 = vadd.f32 %v616_v32, %v3231_v34  ;;  %v665_v45 = vpop.f32.mrf.mxu1  ;;  %v566_v51 = vadd.f32 %v565_v1, %v517_v10  ;;  %v2585_v34 = vld [vmem:[#allocation3 + $0x280] sm:$0xf]  ;;  %v2526_v1 = vor.u32 %v2840_v31, %v2523_v0 }
 0x18f   :  { %v2586_v14 = vor.u32 %v2857_v13, %v2585_v34  ;;  %v2887_v34 = vld [vmem:[#allocation3 + $0x374] sm:$0xf0]  ;;  %v2770_v13 = vld [vmem:[#allocation3 + $0x3f0] sm:$0xf] }
 0x190   :  { %v666_v44 = vadd.f32 %v665_v45, %v617_v35  ;;  %v696_v21 = vmul.f32 %v566_v51, %v3213_v62  ;;  %1465 = vmatpush.bf16.msrb.mxu0 %v2526_v1  ;;  %v3302_v35 = vperm.slane %v2389_v33, 1 }
 0x191   :  { %1416 = vmatpush.bf16.msrb.mxu3 %v2586_v14  ;;  %v2903_v14 = vld [vmem:[#allocation3 + $0x3f4] sm:$0xf0] }
 0x192   :  { %v699_v52 = vmul.f32 %v666_v44, %v3222_v12  ;;  %v3305_v44 = vperm.slane %v2389_v33, 0 }
 0x193   :  { %v518_v53 = vpop.f32.mrf.mxu2 }
 0x194   :  { %v519_v58 = vadd.f32 %v518_v53, %v3234_v38  ;;  %v567_v63 = vpop.f32.mrf.mxu3  ;;  %v715_v3 = vpack.c.bf16 %v699_v52, %v697_v50 }
 0x196   :  { %v568_v2 = vadd.f32 %v567_v63, %v519_v58  ;;  %1008 = vmatmul.bf16.gmra.mxu3 %v715_v3  ;;  %1106 = vmatmul.bf16.gmra.mxu1 %v715_v3 }
 0x198   :  { %v698_v26 = vmul.f32 %v568_v2, %v3219_v11  ;;  %v2707_v2 = vor.u32 %v2887_v34, %v2706_v8 }
 0x19a   :  { %v714_v38 = vpack.c.bf16 %v698_v26, %v696_v21  ;;  %v2771_v26 = vor.u32 %v2903_v14, %v2770_v13  ;;  %1804 = vmatpush.bf16.msra.mxu2 %v2707_v2  ;;  %v2698_v14 = vld [vmem:[#allocation3 + $0x360] sm:$0xf] }
 0x19c   :  { %959 = vmatmul.bf16.gmra.mxu2 %v714_v38  ;;  %1057 = vmatmul.bf16.gmra.mxu0 %v714_v38 }
 0x19d   :  { %1853 = vmatpush.bf16.msra.mxu3 %v2771_v26 }
 0x1a3   :  { %v1072_v32 = vpop.f32.mrf.mxu1 }
 0x1a9   :  { %v1023_v36 = vpop.f32.mrf.mxu0  ;;  %v974_v37 = vpop.f32.mrf.mxu3 }
 0x1aa   :  { %v1024_v10 = vadd.f32 %v1023_v36, %v3302_v35 }
 0x1ab   :  { %v1074_v39 = vpop.f32.mrf.mxu1 }
 0x1ac   :  { %v1073_v52 = vadd.f32 %v1072_v32, %v1024_v10  ;;  %v2708_v10 = vld [vmem:[#allocation3 + $0x378] sm:$0xf0] }
 0x1ae   :  { %v1113_v63 = vmul.f32 %v1073_v52, %v3104_v5 }
 0x1af   :  { %v925_v45 = vpop.f32.mrf.mxu2 }
 0x1b0   :  { %v926_v58 = vadd.f32 %v925_v45, %v3305_v44  ;;  %v2902_v45 = vld [vmem:[#allocation3 + $0x3f4] sm:$0xf] }
 0x1b1   :  { %v1025_v50 = vpop.f32.mrf.mxu0  ;;  %v976_v53 = vpop.f32.mrf.mxu3 }
 0x1b2   :  { %v1026_v51 = vadd.f32 %v1025_v50, %v3302_v35  ;;  %v975_v19 = vadd.f32 %v974_v37, %v926_v58  ;;  %v2886_v37 = vld [vmem:[#allocation3 + $0x374] sm:$0xf] }
 0x1b3   :  { %v1077_v60 = vpop.f32.mrf.mxu1  ;;  %v2711_v52 = vor.u32 %v2886_v37, %v2708_v10 }
 0x1b4   :  { %v1075_v61 = vadd.f32 %v1074_v39, %v1026_v51  ;;  %v1112_v1 = vmul.f32 %v975_v19, %v3101_v4  ;;  %v2772_v51 = vld [vmem:[#allocation3 + $0x3f8] sm:$0xf0]  ;;  %v2885_v19 = vld [vmem:[#allocation3 + $0x364] sm:$0xf0] }
 0x1b5   :  { %1902 = vmatpush.bf16.msra.mxu0 %v2711_v52  ;;  %v2699_v26 = vor.u32 %v2885_v19, %v2698_v14 }
 0x1b6   :  { %v1115_v3 = vmul.f32 %v1075_v61, %v3110_v7 }
 0x1b7   :  { %v927_v59 = vpop.f32.mrf.mxu2  ;;  %1805 = vmatpush.bf16.msra.mxu2 %v2699_v26 }
 0x1b8   :  { %v1145_v20 = vpack.c.bf16 %v1115_v3, %v1113_v63  ;;  %v928_v21 = vadd.f32 %v927_v59, %v3305_v44 }
 0x1b9   :  { %v1028_v38 = vpop.f32.mrf.mxu0  ;;  %v979_v0 = vpop.f32.mrf.mxu3 }
 0x1ba   :  { %v977_v31 = vadd.f32 %v976_v53, %v928_v21  ;;  %1417 = vmatmul.bf16.vlgmr.msrb.gmra.mxu3 %v1145_v20  ;;  %1515 = vmatmul.bf16.vlgmr.msrb.gmra.mxu1 %v1145_v20  ;;  %v1029_v39 = vadd.f32 %v1028_v38, %v3302_v35  ;;  %v2775_v53 = vor.u32 %v2902_v45, %v2772_v51  ;;  %v2762_v20 = vld [vmem:[#allocation3 + $0x3e0] sm:$0xf]  ;;  %v2901_v38 = vld [vmem:[#allocation3 + $0x3e4] sm:$0xf0]  ;;  %v2700_v51 = vld [vmem:[#allocation3 + $0x368] sm:$0xf0] }
 0x1bb   :  { %v1079_v33 = vpop.f32.mrf.mxu1 }
 0x1bc   :  { %v1114_v32 = vmul.f32 %v977_v31, %v3107_v6  ;;  %v1078_v61 = vadd.f32 %v1077_v60, %v1029_v39  ;;  %1951 = vmatpush.bf16.msra.mxu1 %v2775_v53  ;;  %v2900_v53 = vld [vmem:[#allocation3 + $0x3e4] sm:$0xf] }
 0x1be   :  { %v1144_v36 = vpack.c.bf16 %v1114_v32, %v1112_v1  ;;  %v1117_v59 = vmul.f32 %v1078_v61, %v3120_v28  ;;  %v2763_v32 = vor.u32 %v2901_v38, %v2762_v20  ;;  %v2690_v38 = vld [vmem:[#allocation3 + $0x350] sm:$0xf] }
 0x1bf   :  { %v930_v50 = vpop.f32.mrf.mxu2 }
 0x1c0   :  { %1368 = vmatmul.bf16.vlgmr.msrb.gmra.mxu2 %v1144_v36  ;;  %1466 = vmatmul.bf16.vlgmr.msrb.gmra.mxu0 %v1144_v36  ;;  %v931_v8 = vadd.f32 %v930_v50, %v3305_v44 }
 0x1c1   :  { %v1030_v58 = vpop.f32.mrf.mxu0  ;;  %v981_v63 = vpop.f32.mrf.mxu3  ;;  %1854 = vmatpush.bf16.msra.mxu3 %v2763_v32 }
 0x1c2   :  { %v1031_v3 = vadd.f32 %v1030_v58, %v3302_v35  ;;  %v980_v31 = vadd.f32 %v979_v0, %v931_v8  ;;  %v2884_v0 = vld [vmem:[#allocation3 + $0x364] sm:$0xf] }
 0x1c3   :  { %v1082_v13 = vpop.f32.mrf.mxu1  ;;  %v2703_v61 = vor.u32 %v2884_v0, %v2700_v51 }
 0x1c4   :  { %v1080_v34 = vadd.f32 %v1079_v33, %v1031_v3  ;;  %v1116_v37 = vmul.f32 %v980_v31, %v3117_v27  ;;  %v2764_v3 = vld [vmem:[#allocation3 + $0x3e8] sm:$0xf0]  ;;  %v2883_v31 = vld [vmem:[#allocation3 + $0x354] sm:$0xf0] }
 0x1c5   :  { %1903 = vmatpush.bf16.msra.mxu0 %v2703_v61  ;;  %v2691_v32 = vor.u32 %v2883_v31, %v2690_v38 }
 0x1c6   :  { %v1119_v2 = vmul.f32 %v1080_v34, %v3126_v30 }
 0x1c7   :  { %v932_v21 = vpop.f32.mrf.mxu2  ;;  %1806 = vmatpush.bf16.msra.mxu2 %v2691_v32 }
 0x1c8   :  { %v933_v60 = vadd.f32 %v932_v21, %v3305_v44  ;;  %v1147_v1 = vpack.c.bf16 %v1119_v2, %v1117_v59 }
 0x1c9   :  { %v1033_v36 = vpop.f32.mrf.mxu0  ;;  %v984_v33 = vpop.f32.mrf.mxu3 }
 0x1ca   :  { %v982_v39 = vadd.f32 %v981_v63, %v933_v60  ;;  %1422 = vmatmul.bf16.gmra.mxu3 %v1147_v1  ;;  %1520 = vmatmul.bf16.gmra.mxu1 %v1147_v1  ;;  %v1034_v50 = vadd.f32 %v1033_v36, %v3302_v35  ;;  %v2767_v63 = vor.u32 %v2900_v53, %v2764_v3  ;;  %v2754_v60 = vld [vmem:[#allocation3 + $0x3d0] sm:$0xf]  ;;  %v2899_v36 = vld [vmem:[#allocation3 + $0x3d4] sm:$0xf0]  ;;  %v2692_v3 = vld [vmem:[#allocation3 + $0x358] sm:$0xf0] }
 0x1cb   :  { %v1084_v45 = vpop.f32.mrf.mxu1 }
 0x1cc   :  { %v1118_v10 = vmul.f32 %v982_v39, %v3123_v29  ;;  %v1083_v34 = vadd.f32 %v1082_v13, %v1034_v50  ;;  %1952 = vmatpush.bf16.msra.mxu1 %v2767_v63  ;;  %v2898_v63 = vld [vmem:[#allocation3 + $0x3d4] sm:$0xf] }
 0x1ce   :  { %v1146_v52 = vpack.c.bf16 %v1118_v10, %v1116_v37  ;;  %v1121_v21 = vmul.f32 %v1083_v34, %v3136_v55  ;;  %v2755_v10 = vor.u32 %v2899_v36, %v2754_v60  ;;  %v2682_v36 = vld [vmem:[#allocation3 + $0x340] sm:$0xf] }
 0x1cf   :  { %v935_v58 = vpop.f32.mrf.mxu2 }
 0x1d0   :  { %1373 = vmatmul.bf16.gmra.mxu2 %v1146_v52  ;;  %1471 = vmatmul.bf16.gmra.mxu0 %v1146_v52  ;;  %v936_v14 = vadd.f32 %v935_v58, %v3305_v44 }
 0x1d1   :  { %v1035_v8 = vpop.f32.mrf.mxu0  ;;  %v986_v59 = vpop.f32.mrf.mxu3  ;;  %1855 = vmatpush.bf16.msra.mxu3 %v2755_v10 }
 0x1d2   :  { %v1036_v2 = vadd.f32 %v1035_v8, %v3302_v35  ;;  %v985_v39 = vadd.f32 %v984_v33, %v936_v14  ;;  %v2882_v33 = vld [vmem:[#allocation3 + $0x354] sm:$0xf] }
 0x1d3   :  { %v1087_v20 = vpop.f32.mrf.mxu1  ;;  %v2695_v34 = vor.u32 %v2882_v33, %v2692_v3 }
 0x1d4   :  { %v1085_v19 = vadd.f32 %v1084_v45, %v1036_v2  ;;  %v1120_v0 = vmul.f32 %v985_v39, %v3133_v54  ;;  %v2756_v2 = vld [vmem:[#allocation3 + $0x3d8] sm:$0xf0]  ;;  %v2881_v39 = vld [vmem:[#allocation3 + $0x344] sm:$0xf0] }
 0x1d5   :  { %1904 = vmatpush.bf16.msra.mxu0 %v2695_v34  ;;  %v2683_v10 = vor.u32 %v2881_v39, %v2682_v36 }
 0x1d6   :  { %v1123_v26 = vmul.f32 %v1085_v19, %v3142_v57 }
 0x1d7   :  { %v937_v1 = vpop.f32.mrf.mxu2  ;;  %1807 = vmatpush.bf16.msra.mxu2 %v2683_v10 }
 0x1d8   :  { %v938_v13 = vadd.f32 %v937_v1, %v3305_v44  ;;  %v1149_v37 = vpack.c.bf16 %v1123_v26, %v1121_v21 }
 0x1d9   :  { %v1038_v50 = vpop.f32.mrf.mxu0  ;;  %v989_v45 = vpop.f32.mrf.mxu3 }
 0x1da   :  { %v987_v52 = vadd.f32 %v986_v59, %v938_v13  ;;  %1427 = vmatmul.bf16.gmra.mxu3 %v1149_v37  ;;  %1525 = vmatmul.bf16.gmra.mxu1 %v1149_v37  ;;  %v1039_v58 = vadd.f32 %v1038_v50, %v3302_v35  ;;  %v2759_v59 = vor.u32 %v2898_v63, %v2756_v2  ;;  %v2746_v13 = vld [vmem:[#allocation3 + $0x3c0] sm:$0xf]  ;;  %v2897_v50 = vld [vmem:[#allocation3 + $0x3c4] sm:$0xf0]  ;;  %v2684_v2 = vld [vmem:[#allocation3 + $0x348] sm:$0xf0] }
 0x1db   :  { %v1089_v53 = vpop.f32.mrf.mxu1 }
 0x1dc   :  { %v1122_v51 = vmul.f32 %v987_v52, %v3139_v56  ;;  %v1088_v19 = vadd.f32 %v1087_v20, %v1039_v58  ;;  %1953 = vmatpush.bf16.msra.mxu1 %v2759_v59  ;;  %v2896_v59 = vld [vmem:[#allocation3 + $0x3c4] sm:$0xf] }
 0x1de   :  { %v1148_v61 = vpack.c.bf16 %v1122_v51, %v1120_v0  ;;  %v1125_v1 = vmul.f32 %v1088_v19, %v3152_v23  ;;  %v2747_v51 = vor.u32 %v2897_v50, %v2746_v13  ;;  %v2674_v50 = vld [vmem:[#allocation3 + $0x330] sm:$0xf] }
 0x1df   :  { %v940_v8 = vpop.f32.mrf.mxu2 }
 0x1e0   :  { %1378 = vmatmul.bf16.gmra.mxu2 %v1148_v61  ;;  %1476 = vmatmul.bf16.gmra.mxu0 %v1148_v61  ;;  %v941_v38 = vadd.f32 %v940_v8, %v3305_v44 }
 0x1e1   :  { %v1040_v14 = vpop.f32.mrf.mxu0  ;;  %v991_v21 = vpop.f32.mrf.mxu3  ;;  %1856 = vmatpush.bf16.msra.mxu3 %v2747_v51 }
 0x1e2   :  { %v1041_v26 = vadd.f32 %v1040_v14, %v3302_v35  ;;  %v990_v52 = vadd.f32 %v989_v45, %v941_v38  ;;  %v2880_v45 = vld [vmem:[#allocation3 + $0x344] sm:$0xf] }
 0x1e3   :  { %v1092_v60 = vpop.f32.mrf.mxu1  ;;  %v2687_v19 = vor.u32 %v2880_v45, %v2684_v2 }
 0x1e4   :  { %v1090_v31 = vadd.f32 %v1089_v53, %v1041_v26  ;;  %v1124_v33 = vmul.f32 %v990_v52, %v3149_v22  ;;  %v2748_v26 = vld [vmem:[#allocation3 + $0x3c8] sm:$0xf0]  ;;  %v2879_v52 = vld [vmem:[#allocation3 + $0x334] sm:$0xf0] }
 0x1e5   :  { %1905 = vmatpush.bf16.msra.mxu0 %v2687_v19  ;;  %v2675_v51 = vor.u32 %v2879_v52, %v2674_v50 }
 0x1e6   :  { %v1127_v32 = vmul.f32 %v1090_v31, %v3158_v25 }
 0x1e7   :  { %v942_v37 = vpop.f32.mrf.mxu2  ;;  %1808 = vmatpush.bf16.msra.mxu2 %v2675_v51 }
 0x1e8   :  { %v943_v20 = vadd.f32 %v942_v37, %v3305_v44  ;;  %v1151_v0 = vpack.c.bf16 %v1127_v32, %v1125_v1 }
 0x1e9   :  { %v1043_v58 = vpop.f32.mrf.mxu0  ;;  %v994_v53 = vpop.f32.mrf.mxu3 }
 0x1ea   :  { %v992_v61 = vadd.f32 %v991_v21, %v943_v20  ;;  %1432 = vmatmul.bf16.gmra.mxu3 %v1151_v0  ;;  %1530 = vmatmul.bf16.gmra.mxu1 %v1151_v0  ;;  %v1044_v8 = vadd.f32 %v1043_v58, %v3302_v35  ;;  %v2751_v21 = vor.u32 %v2896_v59, %v2748_v26  ;;  %v2738_v20 = vld [vmem:[#allocation3 + $0x3b0] sm:$0xf]  ;;  %v2895_v58 = vld [vmem:[#allocation3 + $0x3b4] sm:$0xf0]  ;;  %v2676_v26 = vld [vmem:[#allocation3 + $0x338] sm:$0xf0] }
 0x1eb   :  { %v1094_v63 = vpop.f32.mrf.mxu1 }
 0x1ec   :  { %v1126_v3 = vmul.f32 %v992_v61, %v3155_v24  ;;  %v1093_v31 = vadd.f32 %v1092_v60, %v1044_v8  ;;  %1954 = vmatpush.bf16.msra.mxu1 %v2751_v21  ;;  %v2894_v21 = vld [vmem:[#allocation3 + $0x3b4] sm:$0xf] }
 0x1ee   :  { %v1150_v34 = vpack.c.bf16 %v1126_v3, %v1124_v33  ;;  %v1129_v37 = vmul.f32 %v1093_v31, %v3171_v48  ;;  %v2739_v3 = vor.u32 %v2895_v58, %v2738_v20  ;;  %v2666_v58 = vld [vmem:[#allocation3 + $0x320] sm:$0xf] }
 0x1ef   :  { %v945_v14 = vpop.f32.mrf.mxu2 }
 0x1f0   :  { %1383 = vmatmul.bf16.gmra.mxu2 %v1150_v34  ;;  %1481 = vmatmul.bf16.gmra.mxu0 %v1150_v34  ;;  %v946_v36 = vadd.f32 %v945_v14, %v3305_v44 }
 0x1f1   :  { %v1045_v38 = vpop.f32.mrf.mxu0  ;;  %v996_v1 = vpop.f32.mrf.mxu3  ;;  %1857 = vmatpush.bf16.msra.mxu3 %v2739_v3 }
 0x1f2   :  { %v1046_v32 = vadd.f32 %v1045_v38, %v3302_v35  ;;  %v995_v61 = vadd.f32 %v994_v53, %v946_v36  ;;  %v2878_v53 = vld [vmem:[#allocation3 + $0x334] sm:$0xf] }
 0x1f3   :  { %v1097_v13 = vpop.f32.mrf.mxu1  ;;  %v2679_v31 = vor.u32 %v2878_v53, %v2676_v26 }
 0x1f4   :  { %v1095_v39 = vadd.f32 %v1094_v63, %v1046_v32  ;;  %v1128_v45 = vmul.f32 %v995_v61, %v3168_v47  ;;  %v2740_v32 = vld [vmem:[#allocation3 + $0x3b8] sm:$0xf0]  ;;  %v2877_v61 = vld [vmem:[#allocation3 + $0x324] sm:$0xf0] }
 0x1f5   :  { %1906 = vmatpush.bf16.msra.mxu0 %v2679_v31  ;;  %v2667_v3 = vor.u32 %v2877_v61, %v2666_v58  ;;  %v2892_v31 = vld [vmem:[#allocation3 + $0x3a4] sm:$0xf]  ;;  %v2891_v61 = vld [vmem:[#allocation3 + $0x394] sm:$0xf0] }
 0x1f6   :  { %v1131_v10 = vmul.f32 %v1095_v39, %v3174_v49 }
 0x1f7   :  { %v947_v0 = vpop.f32.mrf.mxu2  ;;  %1809 = vmatpush.bf16.msra.mxu2 %v2667_v3 }
 0x1f8   :  { %v948_v60 = vadd.f32 %v947_v0, %v3305_v44  ;;  %v1153_v33 = vpack.c.bf16 %v1131_v10, %v1129_v37 }
 0x1f9   :  { %v1048_v8 = vpop.f32.mrf.mxu0  ;;  %v999_v63 = vpop.f32.mrf.mxu3 }
 0x1fa   :  { %v997_v34 = vadd.f32 %v996_v1, %v948_v60  ;;  %1437 = vmatmul.bf16.gmra.mxu3 %v1153_v33  ;;  %1535 = vmatmul.bf16.gmra.mxu1 %v1153_v33  ;;  %v1049_v14 = vadd.f32 %v1048_v8, %v3302_v35  ;;  %v2743_v1 = vor.u32 %v2894_v21, %v2740_v32  ;;  %v2730_v60 = vld [vmem:[#allocation3 + $0x3a0] sm:$0xf]  ;;  %v2893_v8 = vld [vmem:[#allocation3 + $0x3a4] sm:$0xf0]  ;;  %v2876_v21 = vld [vmem:[#allocation3 + $0x324] sm:$0xf] }
 0x1fb   :  { %v1099_v59 = vpop.f32.mrf.mxu1 }
 0x1fc   :  { %v1130_v2 = vmul.f32 %v997_v34, %v3165_v46  ;;  %v1098_v39 = vadd.f32 %v1097_v13, %v1049_v14  ;;  %1955 = vmatpush.bf16.msra.mxu1 %v2743_v1 }
 0x1fe   :  { %v1152_v19 = vpack.c.bf16 %v1130_v2, %v1128_v45  ;;  %v1133_v0 = vmul.f32 %v1098_v39, %v3184_v16  ;;  %v2731_v2 = vor.u32 %v2893_v8, %v2730_v60 }
 0x1ff   :  { %v950_v38 = vpop.f32.mrf.mxu2 }
 0x200   :  { %1388 = vmatmul.bf16.gmra.mxu2 %v1152_v19  ;;  %1486 = vmatmul.bf16.gmra.mxu0 %v1152_v19  ;;  %v951_v50 = vadd.f32 %v950_v38, %v3305_v44  ;;  %v2668_v38 = vld [vmem:[#allocation3 + $0x328] sm:$0xf0] }
 0x201   :  { %v1050_v36 = vpop.f32.mrf.mxu0  ;;  %v1001_v37 = vpop.f32.mrf.mxu3  ;;  %1858 = vmatpush.bf16.msra.mxu3 %v2731_v2  ;;  %v2671_v32 = vor.u32 %v2876_v21, %v2668_v38 }
 0x202   :  { %v1051_v10 = vadd.f32 %v1050_v36, %v3302_v35  ;;  %v1000_v34 = vadd.f32 %v999_v63, %v951_v50  ;;  %v2732_v63 = vld [vmem:[#allocation3 + $0x3a8] sm:$0xf0] }
 0x203   :  { %v1102_v20 = vpop.f32.mrf.mxu1  ;;  %v2735_v39 = vor.u32 %v2892_v31, %v2732_v63  ;;  %1907 = vmatpush.bf16.msra.mxu0 %v2671_v32  ;;  %v2724_v32 = vld [vmem:[#allocation3 + $0x398] sm:$0xf0] }
 0x204   :  { %v1100_v52 = vadd.f32 %v1099_v59, %v1051_v10  ;;  %v1132_v53 = vmul.f32 %v1000_v34, %v3181_v15 }
 0x205   :  { %1956 = vmatpush.bf16.msra.mxu1 %v2735_v39 }
 0x206   :  { %v1135_v51 = vmul.f32 %v1100_v52, %v3190_v18  ;;  %v2875_v52 = vld [vmem:[#allocation3 + $0x314] sm:$0xf0] }
 0x207   :  { %v952_v33 = vpop.f32.mrf.mxu2 }
 0x208   :  { %v953_v13 = vadd.f32 %v952_v33, %v3305_v44  ;;  %v1155_v45 = vpack.c.bf16 %v1135_v51, %v1133_v0  ;;  %v2722_v0 = vld [vmem:[#allocation3 + $0x390] sm:$0xf] }
 0x209   :  { %v1053_v14 = vpop.f32.mrf.mxu0  ;;  %v1004_v59 = vpop.f32.mrf.mxu3  ;;  %v2723_v3 = vor.u32 %v2891_v61, %v2722_v0 }
 0x20a   :  { %v1002_v19 = vadd.f32 %v1001_v37, %v953_v13  ;;  %1442 = vmatmul.bf16.gmra.mxu3 %v1155_v45  ;;  %1540 = vmatmul.bf16.gmra.mxu1 %v1155_v45  ;;  %v1054_v1 = vadd.f32 %v1053_v14, %v3302_v35  ;;  %v2658_v37 = vld [vmem:[#allocation3 + $0x310] sm:$0xf] }
 0x20b   :  { %v1104_v10 = vpop.f32.mrf.mxu1  ;;  %v2659_v58 = vor.u32 %v2875_v52, %v2658_v37  ;;  %1859 = vmatpush.bf16.msra.mxu3 %v2723_v3 }
 0x20c   :  { %v1134_v26 = vmul.f32 %v1002_v19, %v3187_v17  ;;  %v1103_v60 = vadd.f32 %v1102_v20, %v1054_v1  ;;  %v2874_v19 = vld [vmem:[#allocation3 + $0x314] sm:$0xf] }
 0x20d   :  { %1810 = vmatpush.bf16.msra.mxu2 %v2659_v58 }
 0x20e   :  { %v1154_v36 = vpack.c.bf16 %v1134_v26, %v1132_v53  ;;  %v1137_v45 = vmul.f32 %v1103_v60, %v3200_v41  ;;  %v2660_v53 = vld [vmem:[#allocation3 + $0x318] sm:$0xf0]  ;;  %v2890_v26 = vld [vmem:[#allocation3 + $0x394] sm:$0xf] }
 0x20f   :  { %v955_v50 = vpop.f32.mrf.mxu2  ;;  %v2663_v31 = vor.u32 %v2874_v19, %v2660_v53  ;;  %v2650_v19 = vld [vmem:[#allocation3 + $0x300] sm:$0xf]  ;;  %v2873_v53 = vld [vmem:[#allocation3 + $0x304] sm:$0xf0] }
 0x210   :  { %1393 = vmatmul.bf16.gmra.mxu2 %v1154_v36  ;;  %1491 = vmatmul.bf16.gmra.mxu0 %v1154_v36  ;;  %v956_v8 = vadd.f32 %v955_v50, %v3305_v44  ;;  %v2727_v36 = vor.u32 %v2890_v26, %v2724_v32 }
 0x211   :  { %v1055_v51 = vpop.f32.mrf.mxu0  ;;  %v1006_v13 = vpop.f32.mrf.mxu3  ;;  %1908 = vmatpush.bf16.msra.mxu0 %v2663_v31 }
 0x212   :  { %v1056_v33 = vadd.f32 %v1055_v51, %v3302_v35  ;;  %v1005_v21 = vadd.f32 %v1004_v59, %v956_v8  ;;  %1957 = vmatpush.bf16.msra.mxu1 %v2727_v36 }
 0x213   :  { %v1107_v63 = vpop.f32.mrf.mxu1 }
 0x214   :  { %v1105_v34 = vadd.f32 %v1104_v10, %v1056_v33  ;;  %v1136_v10 = vmul.f32 %v1005_v21, %v3197_v40  ;;  %v2651_v21 = vor.u32 %v2873_v53, %v2650_v19 }
 0x216   :  { %v1139_v2 = vmul.f32 %v1105_v34, %v3206_v43  ;;  %1811 = vmatpush.bf16.msra.mxu2 %v2651_v21 }
 0x217   :  { %v957_v14 = vpop.f32.mrf.mxu2 }
 0x218   :  { %v958_v20 = vadd.f32 %v957_v14, %v3305_v44  ;;  %v1157_v38 = vpack.c.bf16 %v1139_v2, %v1137_v45 }
 0x219   :  { %v1058_v1 = vpop.f32.mrf.mxu0  ;;  %v1009_v52 = vpop.f32.mrf.mxu3 }
 0x21a   :  { %v1007_v39 = vadd.f32 %v1006_v13, %v958_v20  ;;  %1447 = vmatmul.bf16.gmra.mxu3 %v1157_v38  ;;  %1545 = vmatmul.bf16.gmra.mxu1 %v1157_v38  ;;  %v1059_v37 = vadd.f32 %v1058_v1, %v3302_v35  ;;  %v2714_v20 = vld [vmem:[#allocation3 + $0x380] sm:$0xf]  ;;  %v2889_v38 = vld [vmem:[#allocation3 + $0x384] sm:$0xf0] }
 0x21b   :  { %v1109_v60 = vpop.f32.mrf.mxu1  ;;  %v2715_v32 = vor.u32 %v2889_v38, %v2714_v20 }
 0x21c   :  { %v1138_v50 = vmul.f32 %v1007_v39, %v3203_v42  ;;  %v1108_v58 = vadd.f32 %v1107_v63, %v1059_v37  ;;  %v2716_v63 = vld [vmem:[#allocation3 + $0x388] sm:$0xf0] }
 0x21d   :  { %1860 = vmatpush.bf16.msra.mxu3 %v2715_v32 }
 0x21e   :  { %v1156_v59 = vpack.c.bf16 %v1138_v50, %v1136_v10  ;;  %v1141_v8 = vmul.f32 %v1108_v58, %v3216_v9  ;;  %v2652_v10 = vld [vmem:[#allocation3 + $0x308] sm:$0xf0] }
 0x21f   :  { %v960_v0 = vpop.f32.mrf.mxu2 }
 0x220   :  { %1398 = vmatmul.bf16.gmra.mxu2 %v1156_v59  ;;  %1496 = vmatmul.bf16.gmra.mxu0 %v1156_v59  ;;  %v961_v33 = vadd.f32 %v960_v0, %v3305_v44 }
 0x221   :  { %v1060_v51 = vpop.f32.mrf.mxu0  ;;  %v1011_v26 = vpop.f32.mrf.mxu3 }
 0x222   :  { %v1061_v61 = vadd.f32 %v1060_v51, %v3302_v35  ;;  %v1010_v45 = vadd.f32 %v1009_v52, %v961_v33  ;;  %v2888_v35 = vld [vmem:[#allocation3 + $0x384] sm:$0xf] }
 0x223   :  { %v2719_v1 = vor.u32 %v2888_v35, %v2716_v63  ;;  %v2518_v52 = vld [vmem:[%s3601_s4 + $0x4] sm:$0x3] }
 0x224   :  { %v1110_v3 = vadd.f32 %v1109_v60, %v1061_v61  ;;  %v1140_v36 = vmul.f32 %v1010_v45, %v3213_v62  ;;  %v3373_v58 = vperm.slane %v2518_v52, 1 }
 0x225   :  { %1958 = vmatpush.bf16.msra.mxu1 %v2719_v1 }
 0x226   :  { %v1143_v34 = vmul.f32 %v1110_v3, %v3222_v12  ;;  %v3376_v3 = vperm.slane %v2518_v52, 0 }
 0x227   :  { %v962_v13 = vpop.f32.mrf.mxu2 }
 0x228   :  { %v963_v2 = vadd.f32 %v962_v13, %v3305_v44  ;;  %v1159_v14 = vpack.c.bf16 %v1143_v34, %v1141_v8  ;;  %v2872_v44 = vld [vmem:[#allocation3 + $0x304] sm:$0xf] }
 0x229   :  { %v2655_v50 = vor.u32 %v2872_v44, %v2652_v10 }
 0x22a   :  { %v1012_v31 = vadd.f32 %v1011_v26, %v963_v2  ;;  %1452 = vmatmul.bf16.gmra.mxu3 %v1159_v14  ;;  %1550 = vmatmul.bf16.gmra.mxu1 %v1159_v14 }
 0x22b   :  { %1909 = vmatpush.bf16.msra.mxu0 %v2655_v50 }
 0x22c   :  { %v1142_v39 = vmul.f32 %v1012_v31, %v3219_v11 }
 0x22e   :  { %v1158_v37 = vpack.c.bf16 %v1142_v39, %v1140_v36 }
 0x230   :  { %1403 = vmatmul.bf16.gmra.mxu2 %v1158_v37  ;;  %1501 = vmatmul.bf16.gmra.mxu0 %v1158_v37 }
 0x237   :  { %v1516_v59 = vpop.f32.mrf.mxu1 }
 0x23d   :  { %v1418_v0 = vpop.f32.mrf.mxu3  ;;  %v1467_v51 = vpop.f32.mrf.mxu0 }
 0x23e   :  { %v1468_v60 = vadd.f32 %v1467_v51, %v3373_v58 }
 0x23f   :  { %v1518_v61 = vpop.f32.mrf.mxu1 }
 0x240   :  { %v1517_v13 = vadd.f32 %v1516_v59, %v1468_v60 }
 0x242   :  { %v1557_v53 = vmul.f32 %v1517_v13, %v3104_v5 }
 0x243   :  { %v1369_v33 = vpop.f32.mrf.mxu2 }
 0x244   :  { %v1370_v14 = vadd.f32 %v1369_v33, %v3376_v3 }
 0x245   :  { %v1420_v8 = vpop.f32.mrf.mxu3  ;;  %v1469_v34 = vpop.f32.mrf.mxu0 }
 0x246   :  { %v1470_v45 = vadd.f32 %v1469_v34, %v3373_v58  ;;  %v1419_v20 = vadd.f32 %v1418_v0, %v1370_v14 }
 0x247   :  { %v1521_v2 = vpop.f32.mrf.mxu1 }
 0x248   :  { %v1519_v19 = vadd.f32 %v1518_v61, %v1470_v45  ;;  %v1556_v36 = vmul.f32 %v1419_v20, %v3101_v4 }
 0x24a   :  { %v1559_v26 = vmul.f32 %v1519_v19, %v3110_v7 }
 0x24b   :  { %v1371_v21 = vpop.f32.mrf.mxu2 }
 0x24c   :  { %v1589_v38 = vpack.c.bf16 %v1559_v26, %v1557_v53  ;;  %v1372_v35 = vadd.f32 %v1371_v21, %v3376_v3 }
 0x24d   :  { %v1423_v31 = vpop.f32.mrf.mxu3  ;;  %v1472_v32 = vpop.f32.mrf.mxu0 }
 0x24e   :  { %v1421_v63 = vadd.f32 %v1420_v8, %v1372_v35  ;;  %1861 = vmatmul.bf16.vlgmr.msra.gmra.mxu3 %v1589_v38  ;;  %1959 = vmatmul.bf16.vlgmr.msra.gmra.mxu1 %v1589_v38  ;;  %v1473_v10 = vadd.f32 %v1472_v32, %v3373_v58 }
 0x24f   :  { %v1523_v1 = vpop.f32.mrf.mxu1 }
 0x250   :  { %v1558_v39 = vmul.f32 %v1421_v63, %v3107_v6  ;;  %v1522_v52 = vadd.f32 %v1521_v2, %v1473_v10 }
 0x252   :  { %v1588_v44 = vpack.c.bf16 %v1558_v39, %v1556_v36  ;;  %v1561_v33 = vmul.f32 %v1522_v52, %v3120_v28 }
 0x253   :  { %v1374_v50 = vpop.f32.mrf.mxu2 }
 0x254   :  { %1812 = vmatmul.bf16.vlgmr.msra.gmra.mxu2 %v1588_v44  ;;  %1910 = vmatmul.bf16.vlgmr.msra.gmra.mxu0 %v1588_v44  ;;  %v1375_v61 = vadd.f32 %v1374_v50, %v3376_v3 }
 0x255   :  { %v1425_v37 = vpop.f32.mrf.mxu3  ;;  %v1474_v59 = vpop.f32.mrf.mxu0 }
 0x256   :  { %v1475_v0 = vadd.f32 %v1474_v59, %v3373_v58  ;;  %v1424_v13 = vadd.f32 %v1423_v31, %v1375_v61 }
 0x257   :  { %v1526_v51 = vpop.f32.mrf.mxu1 }
 0x258   :  { %v1524_v60 = vadd.f32 %v1523_v1, %v1475_v0  ;;  %v1560_v21 = vmul.f32 %v1424_v13, %v3117_v27 }
 0x25a   :  { %v1563_v8 = vmul.f32 %v1524_v60, %v3126_v30 }
 0x25b   :  { %v1376_v34 = vpop.f32.mrf.mxu2 }
 0x25c   :  { %v1377_v45 = vadd.f32 %v1376_v34, %v3376_v3  ;;  %v1591_v14 = vpack.c.bf16 %v1563_v8, %v1561_v33 }
 0x25d   :  { %v1428_v19 = vpop.f32.mrf.mxu3  ;;  %v1477_v53 = vpop.f32.mrf.mxu0 }
 0x25e   :  { %v1426_v26 = vadd.f32 %v1425_v37, %v1377_v45  ;;  %1866 = vmatmul.bf16.gmra.mxu3 %v1591_v14  ;;  %1964 = vmatmul.bf16.gmra.mxu1 %v1591_v14  ;;  %v1478_v38 = vadd.f32 %v1477_v53, %v3373_v58 }
 0x25f   :  { %v1528_v2 = vpop.f32.mrf.mxu1 }
 0x260   :  { %v1562_v20 = vmul.f32 %v1426_v26, %v3123_v29  ;;  %v1527_v1 = vadd.f32 %v1526_v51, %v1478_v38 }
 0x262   :  { %v1590_v35 = vpack.c.bf16 %v1562_v20, %v1560_v21  ;;  %v1565_v50 = vmul.f32 %v1527_v1, %v3136_v55 }
 0x263   :  { %v1379_v32 = vpop.f32.mrf.mxu2 }
 0x264   :  { %1817 = vmatmul.bf16.gmra.mxu2 %v1590_v35  ;;  %1915 = vmatmul.bf16.gmra.mxu0 %v1590_v35  ;;  %v1380_v44 = vadd.f32 %v1379_v32, %v3376_v3 }
 0x265   :  { %v1430_v31 = vpop.f32.mrf.mxu3  ;;  %v1479_v63 = vpop.f32.mrf.mxu0 }
 0x266   :  { %v1480_v36 = vadd.f32 %v1479_v63, %v3373_v58  ;;  %v1429_v52 = vadd.f32 %v1428_v19, %v1380_v44 }
 0x267   :  { %v1531_v39 = vpop.f32.mrf.mxu1 }
 0x268   :  { %v1529_v10 = vadd.f32 %v1528_v2, %v1480_v36  ;;  %v1564_v34 = vmul.f32 %v1429_v52, %v3133_v54 }
 0x26a   :  { %v1567_v37 = vmul.f32 %v1529_v10, %v3142_v57 }
 0x26b   :  { %v1381_v59 = vpop.f32.mrf.mxu2 }
 0x26c   :  { %v1382_v0 = vadd.f32 %v1381_v59, %v3376_v3  ;;  %v1593_v61 = vpack.c.bf16 %v1567_v37, %v1565_v50 }
 0x26d   :  { %v1433_v60 = vpop.f32.mrf.mxu3  ;;  %v1482_v33 = vpop.f32.mrf.mxu0 }
 0x26e   :  { %v1431_v8 = vadd.f32 %v1430_v31, %v1382_v0  ;;  %1871 = vmatmul.bf16.gmra.mxu3 %v1593_v61  ;;  %1969 = vmatmul.bf16.gmra.mxu1 %v1593_v61  ;;  %v1483_v45 = vadd.f32 %v1482_v33, %v3373_v58 }
 0x26f   :  { %v1533_v51 = vpop.f32.mrf.mxu1 }
 0x270   :  { %v1566_v13 = vmul.f32 %v1431_v8, %v3139_v56  ;;  %v1532_v2 = vadd.f32 %v1531_v39, %v1483_v45 }
 0x272   :  { %v1592_v14 = vpack.c.bf16 %v1566_v13, %v1564_v34  ;;  %v1569_v32 = vmul.f32 %v1532_v2, %v3152_v23 }
 0x273   :  { %v1384_v53 = vpop.f32.mrf.mxu2 }
 0x274   :  { %1822 = vmatmul.bf16.gmra.mxu2 %v1592_v14  ;;  %1920 = vmatmul.bf16.gmra.mxu0 %v1592_v14  ;;  %v1385_v38 = vadd.f32 %v1384_v53, %v3376_v3 }
 0x275   :  { %v1435_v19 = vpop.f32.mrf.mxu3  ;;  %v1484_v26 = vpop.f32.mrf.mxu0 }
 0x276   :  { %v1485_v21 = vadd.f32 %v1484_v26, %v3373_v58  ;;  %v1434_v1 = vadd.f32 %v1433_v60, %v1385_v38 }
 0x277   :  { %v1536_v20 = vpop.f32.mrf.mxu1 }
 0x278   :  { %v1534_v35 = vadd.f32 %v1533_v51, %v1485_v21  ;;  %v1568_v59 = vmul.f32 %v1434_v1, %v3149_v22 }
 0x27a   :  { %v1571_v31 = vmul.f32 %v1534_v35, %v3158_v25 }
 0x27b   :  { %v1386_v63 = vpop.f32.mrf.mxu2 }
 0x27c   :  { %v1387_v36 = vadd.f32 %v1386_v63, %v3376_v3  ;;  %v1595_v44 = vpack.c.bf16 %v1571_v31, %v1569_v32 }
 0x27d   :  { %v1438_v10 = vpop.f32.mrf.mxu3  ;;  %v1487_v50 = vpop.f32.mrf.mxu0 }
 0x27e   :  { %v1436_v37 = vadd.f32 %v1435_v19, %v1387_v36  ;;  %1876 = vmatmul.bf16.gmra.mxu3 %v1595_v44  ;;  %1974 = vmatmul.bf16.gmra.mxu1 %v1595_v44  ;;  %v1488_v0 = vadd.f32 %v1487_v50, %v3373_v58 }
 0x27f   :  { %v1538_v39 = vpop.f32.mrf.mxu1 }
 0x280   :  { %v1570_v52 = vmul.f32 %v1436_v37, %v3155_v24  ;;  %v1537_v51 = vadd.f32 %v1536_v20, %v1488_v0 }
 0x282   :  { %v1594_v61 = vpack.c.bf16 %v1570_v52, %v1568_v59  ;;  %v1573_v53 = vmul.f32 %v1537_v51, %v3171_v48 }
 0x283   :  { %v1389_v33 = vpop.f32.mrf.mxu2 }
 0x284   :  { %1827 = vmatmul.bf16.gmra.mxu2 %v1594_v61  ;;  %1925 = vmatmul.bf16.gmra.mxu0 %v1594_v61  ;;  %v1390_v45 = vadd.f32 %v1389_v33, %v3376_v3  ;;  %v2944_v61 = vmov 0   ;;  %v2118_v33 = vld [vmem:[#allocation2] sm:$0x1] }
 0x285   :  { %v1440_v60 = vpop.f32.mrf.mxu3  ;;  %v1489_v8 = vpop.f32.mrf.mxu0  ;;  %2914 = vset.pattern.permute.xlu0 %v2944_v61 }
 0x286   :  { %v1490_v34 = vadd.f32 %v1489_v8, %v3373_v58  ;;  %v1439_v2 = vadd.f32 %v1438_v10, %v1390_v45  ;;  %2121 = vperm.xlu0 %2914, %v2118_v33  }
 0x287   :  { %v1541_v13 = vpop.f32.mrf.mxu1 }
 0x288   :  { %v1539_v14 = vadd.f32 %v1538_v39, %v1490_v34  ;;  %v1572_v63 = vmul.f32 %v1439_v2, %v3168_v47 }
 0x28a   :  { %v1575_v19 = vmul.f32 %v1539_v14, %v3174_v49 }
 0x28b   :  { %v1391_v26 = vpop.f32.mrf.mxu2 }
 0x28c   :  { %v1392_v21 = vadd.f32 %v1391_v26, %v3376_v3  ;;  %v1597_v38 = vpack.c.bf16 %v1575_v19, %v1573_v53 }
 0x28d   :  { %v1443_v35 = vpop.f32.mrf.mxu3  ;;  %v1492_v32 = vpop.f32.mrf.mxu0 }
 0x28e   :  { %v1441_v31 = vadd.f32 %v1440_v60, %v1392_v21  ;;  %1881 = vmatmul.bf16.gmra.mxu3 %v1597_v38  ;;  %1979 = vmatmul.bf16.gmra.mxu1 %v1597_v38  ;;  %v1493_v36 = vadd.f32 %v1492_v32, %v3373_v58 }
 0x28f   :  { %v1543_v20 = vpop.f32.mrf.mxu1 }
 0x290   :  { %v1574_v1 = vmul.f32 %v1441_v31, %v3165_v46  ;;  %v1542_v39 = vadd.f32 %v1541_v13, %v1493_v36 }
 0x292   :  { %v1596_v44 = vpack.c.bf16 %v1574_v1, %v1572_v63  ;;  %v1577_v8 = vmul.f32 %v1542_v39, %v3184_v16 }
 0x293   :  { %v1394_v50 = vpop.f32.mrf.mxu2 }
 0x294   :  { %1832 = vmatmul.bf16.gmra.mxu2 %v1596_v44  ;;  %1930 = vmatmul.bf16.gmra.mxu0 %v1596_v44  ;;  %v1395_v52 = vadd.f32 %v1394_v50, %v3376_v3 }
 0x295   :  { %v1445_v10 = vpop.f32.mrf.mxu3  ;;  %v1494_v37 = vpop.f32.mrf.mxu0 }
 0x296   :  { %v1495_v59 = vadd.f32 %v1494_v37, %v3373_v58  ;;  %v1444_v45 = vadd.f32 %v1443_v35, %v1395_v52 }
 0x297   :  { %v1546_v60 = vpop.f32.mrf.mxu1 }
 0x298   :  { %v1544_v0 = vadd.f32 %v1543_v20, %v1495_v59  ;;  %v1576_v2 = vmul.f32 %v1444_v45, %v3181_v15 }
 0x29a   :  { %v1579_v51 = vmul.f32 %v1544_v0, %v3190_v18 }
 0x29b   :  { %v1396_v34 = vpop.f32.mrf.mxu2 }
 0x29c   :  { %v1397_v14 = vadd.f32 %v1396_v34, %v3376_v3  ;;  %v1599_v53 = vpack.c.bf16 %v1579_v51, %v1577_v8 }
 0x29d   :  { %v1497_v13 = vpop.f32.mrf.mxu0  ;;  %v1448_v26 = vpop.f32.mrf.mxu3 }
 0x29e   :  { %v1446_v19 = vadd.f32 %v1445_v10, %v1397_v14  ;;  %1886 = vmatmul.bf16.gmra.mxu3 %v1599_v53  ;;  %1984 = vmatmul.bf16.gmra.mxu1 %v1599_v53  ;;  %v1498_v38 = vadd.f32 %v1497_v13, %v3373_v58 }
 0x29f   :  { %v1548_v31 = vpop.f32.mrf.mxu1 }
 0x2a0   :  { %v1578_v21 = vmul.f32 %v1446_v19, %v3187_v17  ;;  %v1547_v63 = vadd.f32 %v1546_v60, %v1498_v38 }
 0x2a2   :  { %v1598_v32 = vpack.c.bf16 %v1578_v21, %v1576_v2  ;;  %v1581_v10 = vmul.f32 %v1547_v63, %v3200_v41 }
 0x2a3   :  { %v1399_v20 = vpop.f32.mrf.mxu2 }
 0x2a4   :  { %1837 = vmatmul.bf16.gmra.mxu2 %v1598_v32  ;;  %1935 = vmatmul.bf16.gmra.mxu0 %v1598_v32  ;;  %v1400_v36 = vadd.f32 %v1399_v20, %v3376_v3 }
 0x2a5   :  { %v1499_v35 = vpop.f32.mrf.mxu0  ;;  %v1450_v50 = vpop.f32.mrf.mxu3 }
 0x2a6   :  { %v1500_v1 = vadd.f32 %v1499_v35, %v3373_v58  ;;  %v1449_v59 = vadd.f32 %v1448_v26, %v1400_v36 }
 0x2a7   :  { %v1551_v61 = vpop.f32.mrf.mxu1 }
 0x2a8   :  { %v1549_v44 = vadd.f32 %v1548_v31, %v1500_v1  ;;  %v1580_v60 = vmul.f32 %v1449_v59, %v3197_v40 }
 0x2aa   :  { %v1583_v37 = vmul.f32 %v1549_v44, %v3206_v43 }
 0x2ab   :  { %v1401_v39 = vpop.f32.mrf.mxu2 }
 0x2ac   :  { %v1402_v52 = vadd.f32 %v1401_v39, %v3376_v3  ;;  %v1601_v0 = vpack.c.bf16 %v1583_v37, %v1581_v10  ;;  %v2647_v39 = vld [vmem:[%s3601_s4 + $0x6] sm:$0x3] }
 0x2ad   :  { %v1502_v33 = vpop.f32.mrf.mxu0  ;;  %v1453_v14 = vpop.f32.mrf.mxu3  ;;  %v3444_v59 = vperm.slane %v2647_v39, 1 }
 0x2ae   :  { %v1451_v8 = vadd.f32 %v1450_v50, %v1402_v52  ;;  %1891 = vmatmul.bf16.gmra.mxu3 %v1601_v0  ;;  %1989 = vmatmul.bf16.gmra.mxu1 %v1601_v0  ;;  %v1503_v34 = vadd.f32 %v1502_v33, %v3373_v58  ;;  %v3447_v33 = vperm.slane %v2647_v39, 0 }
 0x2af   :  { %v1553_v2 = vpop.f32.mrf.mxu1 }
 0x2b0   :  { %v1582_v51 = vmul.f32 %v1451_v8, %v3203_v42  ;;  %v1552_v19 = vadd.f32 %v1551_v61, %v1503_v34 }
 0x2b2   :  { %v1600_v45 = vpack.c.bf16 %v1582_v51, %v1580_v60  ;;  %v1585_v32 = vmul.f32 %v1552_v19, %v3216_v9  ;;  %v2032_v60 = vld [vmem:[%s3602_s5] sm:$0x3] }
 0x2b3   :  { %v1404_v53 = vpop.f32.mrf.mxu2 }
 0x2b4   :  { %1842 = vmatmul.bf16.gmra.mxu2 %v1600_v45  ;;  %1940 = vmatmul.bf16.gmra.mxu0 %v1600_v45  ;;  %v1405_v21 = vadd.f32 %v1404_v53, %v3376_v3  ;;  %v3453_v53 = vperm.slane %v2032_v60, 1 }
 0x2b5   :  { %v1504_v13 = vpop.f32.mrf.mxu0  ;;  %v1455_v36 = vpop.f32.mrf.mxu3 }
 0x2b6   :  { %v1505_v26 = vadd.f32 %v1504_v13, %v3373_v58  ;;  %v1454_v35 = vadd.f32 %v1453_v14, %v1405_v21 }
 0x2b8   :  { %v1554_v38 = vadd.f32 %v1553_v2, %v1505_v26  ;;  %v1584_v50 = vmul.f32 %v1454_v35, %v3213_v62  ;;  %v3457_v2 = vperm.slane %v2032_v60, 0 }
 0x2ba   :  { %v1587_v31 = vmul.f32 %v1554_v38, %v3222_v12 }
 0x2bb   :  { %v1406_v20 = vpop.f32.mrf.mxu2 }
 0x2bc   :  { %v1407_v63 = vadd.f32 %v1406_v20, %v3376_v3  ;;  %v1603_v1 = vpack.c.bf16 %v1587_v31, %v1585_v32 }
 0x2be   :  { %v1456_v44 = vadd.f32 %v1455_v36, %v1407_v63  ;;  %1896 = vmatmul.bf16.gmra.mxu3 %v1603_v1  ;;  %1994 = vmatmul.bf16.gmra.mxu1 %v1603_v1 }
 0x2c0   :  { %v1586_v58 = vmul.f32 %v1456_v44, %v3219_v11 }
 0x2c2   :  { %v1602_v10 = vpack.c.bf16 %v1586_v58, %v1584_v50 }
 0x2c4   :  { %1847 = vmatmul.bf16.gmra.mxu2 %v1602_v10  ;;  %1945 = vmatmul.bf16.gmra.mxu0 %v1602_v10 }
 0x2cb   :  { %v1960_v37 = vpop.f32.mrf.mxu1 }
 0x2d1   :  { %v1862_v3 = vpop.f32.mrf.mxu3  ;;  %v1911_v52 = vpop.f32.mrf.mxu0 }
 0x2d2   :  { %v1912_v0 = vadd.f32 %v1911_v52, %v3444_v59 }
 0x2d3   :  { %v1962_v61 = vpop.f32.mrf.mxu1 }
 0x2d4   :  { %v1961_v8 = vadd.f32 %v1960_v37, %v1912_v0 }
 0x2d6   :  { %v2001_v13 = vmul.f32 %v1961_v8, %v3104_v5 }
 0x2d7   :  { %v1813_v51 = vpop.f32.mrf.mxu2 }
 0x2d8   :  { %v1814_v34 = vadd.f32 %v1813_v51, %v3447_v33  ;;  %v2039_v20 = vmul.f32 %v3453_v53, %v2001_v13 }
 0x2d9   :  { %v1864_v45 = vpop.f32.mrf.mxu3  ;;  %v1913_v14 = vpop.f32.mrf.mxu0 }
 0x2da   :  { %v1863_v19 = vadd.f32 %v1862_v3, %v1814_v34  ;;  %v1914_v26 = vadd.f32 %v1913_v14, %v3444_v59 }
 0x2db   :  { %v1965_v21 = vpop.f32.mrf.mxu1 }
 0x2dc   :  { %v2000_v38 = vmul.f32 %v1863_v19, %v3101_v4  ;;  %v1963_v32 = vadd.f32 %v1962_v61, %v1914_v26 }
 0x2de   :  { %v2038_v31 = vmul.f32 %v3457_v2, %v2000_v38  ;;  %v2003_v58 = vmul.f32 %v1963_v32, %v3110_v7 }
 0x2df   :  { %v1815_v35 = vpop.f32.mrf.mxu2 }
 0x2e0   :  { %v1816_v63 = vadd.f32 %v1815_v35, %v3447_v33  ;;  %v2070_v1 = vadd.f32 %v2039_v20, %v2038_v31  ;;  %v2041_v3 = vmul.f32 %v3453_v53, %v2003_v58 }
 0x2e1   :  { %v1867_v36 = vpop.f32.mrf.mxu3  ;;  %v1916_v44 = vpop.f32.mrf.mxu0 }
 0x2e2   :  { %v1865_v5 = vadd.f32 %v1864_v45, %v1816_v63  ;;  %v1917_v50 = vadd.f32 %v1916_v44, %v3444_v59  ;;  %2071 = vadd.xlane.f32.xlu0 %v2070_v1 }
 0x2e3   :  { %v1967_v10 = vpop.f32.mrf.mxu1 }
 0x2e4   :  { %v2002_v4 = vmul.f32 %v1865_v5, %v3107_v6  ;;  %v1966_v37 = vadd.f32 %v1965_v21, %v1917_v50 }
 0x2e6   :  { %v2040_v39 = vmul.f32 %v3457_v2, %v2002_v4  ;;  %v2005_v51 = vmul.f32 %v1966_v37, %v3120_v28 }
 0x2e7   :  { %v1818_v52 = vpop.f32.mrf.mxu2 }
 0x2e8   :  { %v1819_v0 = vadd.f32 %v1818_v52, %v3447_v33  ;;  %v2073_v61 = vadd.f32 %v2041_v3, %v2040_v39  ;;  %v2043_v19 = vmul.f32 %v3453_v53, %v2005_v51 }
 0x2e9   :  { %v1869_v8 = vpop.f32.mrf.mxu3  ;;  %v1918_v60 = vpop.f32.mrf.mxu0 }
 0x2ea   :  { %v1868_v34 = vadd.f32 %v1867_v36, %v1819_v0  ;;  %v1919_v45 = vadd.f32 %v1918_v60, %v3444_v59  ;;  %2074 = vadd.xlane.f32.xlu1 %v2073_v61 }
 0x2eb   :  { %v1970_v7 = vpop.f32.mrf.mxu1 }
 0x2ec   :  { %v2004_v6 = vmul.f32 %v1868_v34, %v3117_v27  ;;  %v1968_v14 = vadd.f32 %v1967_v10, %v1919_v45 }
 0x2ee   :  { %v2042_v13 = vmul.f32 %v3457_v2, %v2004_v6  ;;  %v2007_v35 = vmul.f32 %v1968_v14, %v3126_v30 }
 0x2ef   :  { %v1820_v26 = vpop.f32.mrf.mxu2 }
 0x2f0   :  { %v1821_v21 = vadd.f32 %v1820_v26, %v3447_v33  ;;  %v2076_v38 = vadd.f32 %v2043_v19, %v2042_v13  ;;  %v2045_v44 = vmul.f32 %v3453_v53, %v2007_v35 }
 0x2f1   :  { %v1872_v32 = vpop.f32.mrf.mxu3  ;;  %v1921_v31 = vpop.f32.mrf.mxu0 }
 0x2f2   :  { %v1870_v20 = vadd.f32 %v1869_v8, %v1821_v21  ;;  %v1922_v28 = vadd.f32 %v1921_v31, %v3444_v59  ;;  %2077 = vadd.xlane.f32.xlu1 %v2076_v38 }
 0x2f3   :  { %v1972_v63 = vpop.f32.mrf.mxu1 }
 0x2f4   :  { %v2006_v27 = vmul.f32 %v1870_v20, %v3123_v29  ;;  %v1971_v1 = vadd.f32 %v1970_v7, %v1922_v28 }
 0x2f6   :  { %v2044_v36 = vmul.f32 %v3457_v2, %v2006_v27  ;;  %v2009_v37 = vmul.f32 %v1971_v1, %v3136_v55 }
 0x2f7   :  { %v1823_v5 = vpop.f32.mrf.mxu2 }
 0x2f8   :  { %v1824_v50 = vadd.f32 %v1823_v5, %v3447_v33  ;;  %v2079_v58 = vadd.f32 %v2045_v44, %v2044_v36  ;;  %v2047_v61 = vmul.f32 %v3453_v53, %v2009_v37 }
 0x2f9   :  { %v1874_v10 = vpop.f32.mrf.mxu3  ;;  %v1923_v4 = vpop.f32.mrf.mxu0 }
 0x2fa   :  { %v1873_v39 = vadd.f32 %v1872_v32, %v1824_v50  ;;  %v1924_v3 = vadd.f32 %v1923_v4, %v3444_v59  ;;  %2080 = vadd.xlane.f32.xlu2 %v2079_v58 }
 0x2fb   :  { %v1975_v30 = vpop.f32.mrf.mxu1 }
 0x2fc   :  { %v2008_v29 = vmul.f32 %v1873_v39, %v3133_v54  ;;  %v1973_v52 = vadd.f32 %v1972_v63, %v1924_v3 }
 0x2fe   :  { %v2046_v0 = vmul.f32 %v3457_v2, %v2008_v29  ;;  %v2011_v55 = vmul.f32 %v1973_v52, %v3142_v57 }
 0x2ff   :  { %v1825_v8 = vpop.f32.mrf.mxu2 }
 0x300   :  { %v1826_v60 = vadd.f32 %v1825_v8, %v3447_v33  ;;  %v2082_v51 = vadd.f32 %v2047_v61, %v2046_v0  ;;  %v2049_v26 = vmul.f32 %v3453_v53, %v2011_v55 }
 0x301   :  { %v1877_v34 = vpop.f32.mrf.mxu3  ;;  %v1926_v45 = vpop.f32.mrf.mxu0 }
 0x302   :  { %v1875_v7 = vadd.f32 %v1874_v10, %v1826_v60  ;;  %v1927_v6 = vadd.f32 %v1926_v45, %v3444_v59  ;;  %2083 = vadd.xlane.f32.xlu2 %v2082_v51 }
 0x303   :  { %v1977_v14 = vpop.f32.mrf.mxu1 }
 0x304   :  { %v2010_v54 = vmul.f32 %v1875_v7, %v3139_v56  ;;  %v1976_v13 = vadd.f32 %v1975_v30, %v1927_v6 }
 0x306   :  { %v2048_v19 = vmul.f32 %v3457_v2, %v2010_v54  ;;  %v2013_v57 = vmul.f32 %v1976_v13, %v3152_v23 }
 0x307   :  { %v1828_v21 = vpop.f32.mrf.mxu2 }
 0x308   :  { %v1829_v38 = vadd.f32 %v1828_v21, %v3447_v33  ;;  %v2085_v32 = vadd.f32 %v2049_v26, %v2048_v19  ;;  %v2051_v36 = vmul.f32 %v3453_v53, %v2013_v57 }
 0x309   :  { %v1879_v31 = vpop.f32.mrf.mxu3  ;;  %v1928_v20 = vpop.f32.mrf.mxu0 }
 0x30a   :  { %v1878_v28 = vadd.f32 %v1877_v34, %v1829_v38  ;;  %v1929_v35 = vadd.f32 %v1928_v20, %v3444_v59  ;;  %2086 = vadd.xlane.f32.xlu1 %v2085_v32 }
 0x30b   :  { %v1980_v63 = vpop.f32.mrf.mxu1 }
 0x30c   :  { %v2012_v56 = vmul.f32 %v1878_v28, %v3149_v22  ;;  %v1978_v27 = vadd.f32 %v1977_v14, %v1929_v35 }
 0x30e   :  { %v2050_v1 = vmul.f32 %v3457_v2, %v2012_v56  ;;  %v2015_v23 = vmul.f32 %v1978_v27, %v3158_v25 }
 0x30f   :  { %v1830_v44 = vpop.f32.mrf.mxu2 }
 0x310   :  { %v1831_v5 = vadd.f32 %v1830_v44, %v3447_v33  ;;  %v2088_v50 = vadd.f32 %v2051_v36, %v2050_v1  ;;  %v2053_v29 = vmul.f32 %v3453_v53, %v2015_v23 }
 0x311   :  { %v1882_v58 = vpop.f32.mrf.mxu3  ;;  %v1931_v10 = vpop.f32.mrf.mxu0 }
 0x312   :  { %v1880_v4 = vadd.f32 %v1879_v31, %v1831_v5  ;;  %v1932_v37 = vadd.f32 %v1931_v10, %v3444_v59  ;;  %2089 = vadd.xlane.f32.xlu2 %v2088_v50 }
 0x313   :  { %v1982_v39 = vpop.f32.mrf.mxu1 }
 0x314   :  { %v2014_v22 = vmul.f32 %v1880_v4, %v3155_v24  ;;  %v1981_v3 = vadd.f32 %v1980_v63, %v1932_v37 }
 0x316   :  { %v2052_v30 = vmul.f32 %v3457_v2, %v2014_v22  ;;  %v2017_v25 = vmul.f32 %v1981_v3, %v3171_v48 }
 0x317   :  { %v1833_v52 = vpop.f32.mrf.mxu2 }
 0x318   :  { %v1834_v0 = vadd.f32 %v1833_v52, %v3447_v33  ;;  %v2091_v61 = vadd.f32 %v2053_v29, %v2052_v30  ;;  %v2055_v6 = vmul.f32 %v3453_v53, %v2017_v25 }
 0x319   :  { %v1884_v8 = vpop.f32.mrf.mxu3  ;;  %v1933_v60 = vpop.f32.mrf.mxu0 }
 0x31a   :  { %v1883_v51 = vadd.f32 %v1882_v58, %v1834_v0  ;;  %v1934_v34 = vadd.f32 %v1933_v60, %v3444_v59  ;;  %2092 = vadd.xlane.f32.xlu1 %v2091_v61 }
 0x31b   :  { %v1985_v45 = vpop.f32.mrf.mxu1 }
 0x31c   :  { %v2016_v24 = vmul.f32 %v1883_v51, %v3168_v47  ;;  %v1983_v55 = vadd.f32 %v1982_v39, %v1934_v34 }
 0x31e   :  { %v2054_v7 = vmul.f32 %v3457_v2, %v2016_v24  ;;  %v2019_v48 = vmul.f32 %v1983_v55, %v3174_v49 }
 0x31f   :  { %v1835_v14 = vpop.f32.mrf.mxu2 }
 0x320   :  { %v1836_v54 = vadd.f32 %v1835_v14, %v3447_v33  ;;  %v2094_v13 = vadd.f32 %v2055_v6, %v2054_v7  ;;  %v2057_v57 = vmul.f32 %v3453_v53, %v2019_v48 }
 0x321   :  { %v1887_v19 = vpop.f32.mrf.mxu3  ;;  %v1936_v26 = vpop.f32.mrf.mxu0 }
 0x322   :  { %v1885_v21 = vadd.f32 %v1884_v8, %v1836_v54  ;;  %v1937_v38 = vadd.f32 %v1936_v26, %v3444_v59  ;;  %2095 = vadd.xlane.f32.xlu2 %v2094_v13 }
 0x323   :  { %v1987_v47 = vpop.f32.mrf.mxu1 }
 0x324   :  { %v2018_v32 = vmul.f32 %v1885_v21, %v3165_v46  ;;  %v1986_v31 = vadd.f32 %v1985_v45, %v1937_v38 }
 0x326   :  { %v2056_v20 = vmul.f32 %v3457_v2, %v2018_v32  ;;  %v2021_v49 = vmul.f32 %v1986_v31, %v3184_v16 }
 0x327   :  { %v1838_v28 = vpop.f32.mrf.mxu2 }
 0x328   :  { %v1839_v35 = vadd.f32 %v1838_v28, %v3447_v33  ;;  %v2097_v63 = vadd.f32 %v2057_v57, %v2056_v20  ;;  %v2059_v50 = vmul.f32 %v3453_v53, %v2021_v49 }
 0x329   :  { %v1889_v56 = vpop.f32.mrf.mxu3  ;;  %v1938_v27 = vpop.f32.mrf.mxu0 }
 0x32a   :  { %v1888_v1 = vadd.f32 %v1887_v19, %v1839_v35  ;;  %v1939_v36 = vadd.f32 %v1938_v27, %v3444_v59  ;;  %2098 = vadd.xlane.f32.xlu1 %v2097_v63 }
 0x32b   :  { %v1990_v58 = vpop.f32.mrf.mxu1 }
 0x32c   :  { %v2020_v46 = vmul.f32 %v1888_v1, %v3181_v15  ;;  %v1988_v44 = vadd.f32 %v1987_v47, %v1939_v36 }
 0x32e   :  { %v2058_v5 = vmul.f32 %v3457_v2, %v2020_v46  ;;  %v2023_v39 = vmul.f32 %v1988_v44, %v3190_v18 }
 0x32f   :  { %v1840_v10 = vpop.f32.mrf.mxu2 }
 0x330   :  { %v1841_v23 = vadd.f32 %v1840_v10, %v3447_v33  ;;  %v2100_v4 = vadd.f32 %v2059_v50, %v2058_v5  ;;  %v2061_v52 = vmul.f32 %v3453_v53, %v2023_v39 }
 0x331   :  { %v1941_v37 = vpop.f32.mrf.mxu0  ;;  %v1892_v3 = vpop.f32.mrf.mxu3 }
 0x332   :  { %v1890_v16 = vadd.f32 %v1889_v56, %v1841_v23  ;;  %v1942_v22 = vadd.f32 %v1941_v37, %v3444_v59  ;;  %2101 = vadd.xlane.f32.xlu2 %v2100_v4 }
 0x333   :  { %v1992_v60 = vpop.f32.mrf.mxu1 }
 0x334   :  { %v2022_v15 = vmul.f32 %v1890_v16, %v3187_v17  ;;  %v1991_v30 = vadd.f32 %v1990_v58, %v1942_v22 }
 0x336   :  { %v2060_v29 = vmul.f32 %v3457_v2, %v2022_v15  ;;  %v2025_v18 = vmul.f32 %v1991_v30, %v3200_v41 }
 0x337   :  { %v1843_v0 = vpop.f32.mrf.mxu2 }
 0x338   :  { %v1844_v61 = vadd.f32 %v1843_v0, %v3447_v33  ;;  %v2103_v8 = vadd.f32 %v2061_v52, %v2060_v29  ;;  %v2063_v7 = vmul.f32 %v3453_v53, %v2025_v18 }
 0x339   :  { %v1943_v25 = vpop.f32.mrf.mxu0  ;;  %v1894_v17 = vpop.f32.mrf.mxu3 }
 0x33a   :  { %v1893_v51 = vadd.f32 %v1892_v3, %v1844_v61  ;;  %v1944_v34 = vadd.f32 %v1943_v25, %v3444_v59  ;;  %2104 = vadd.xlane.f32.xlu1 %v2103_v8  ;;  %v2122_v3 = vpop.permute.xlu0 %2121 }
 0x33b   :  { %v1995_v48 = vpop.f32.mrf.mxu1  ;;  %v3551_v52 = vperm.slane %v2122_v3, 0 }
 0x33c   :  { %v2024_v45 = vmul.f32 %v1893_v51, %v3197_v40  ;;  %v1993_v24 = vadd.f32 %v1992_v60, %v1944_v34 }
 0x33e   :  { %v2062_v55 = vmul.f32 %v3457_v2, %v2024_v45  ;;  %v2027_v19 = vmul.f32 %v1993_v24, %v3206_v43 }
 0x33f   :  { %v1845_v6 = vpop.f32.mrf.mxu2 }
 0x340   :  { %v1846_v14 = vadd.f32 %v1845_v6, %v3447_v33  ;;  %v2106_v54 = vadd.f32 %v2063_v7, %v2062_v55  ;;  %v2065_v32 = vmul.f32 %v3453_v53, %v2027_v19 }
 0x341   :  { %v1946_v13 = vpop.f32.mrf.mxu0  ;;  %v1897_v47 = vpop.f32.mrf.mxu3 }
 0x342   :  { %v1895_v41 = vadd.f32 %v1894_v17, %v1846_v14  ;;  %v1947_v26 = vadd.f32 %v1946_v13, %v3444_v59  ;;  %2107 = vadd.xlane.f32.xlu2 %v2106_v54 }
 0x344   :  { %v2026_v40 = vmul.f32 %v1895_v41, %v3203_v42  ;;  %v1996_v21 = vadd.f32 %v1995_v48, %v1947_v26  ;;  %v1997_v42 = vpop.f32.mrf.mxu1 }
 0x346   :  { %v2064_v38 = vmul.f32 %v3457_v2, %v2026_v40  ;;  %v2029_v43 = vmul.f32 %v1996_v21, %v3216_v9 }
 0x347   :  { %v1848_v31 = vpop.f32.mrf.mxu2 }
 0x348   :  { %v1849_v20 = vadd.f32 %v1848_v31, %v3447_v33  ;;  %v2109_v57 = vadd.f32 %v2065_v32, %v2064_v38  ;;  %v2067_v1 = vmul.f32 %v3453_v53, %v2029_v43 }
 0x349   :  { %v1948_v28 = vpop.f32.mrf.mxu0  ;;  %v1899_v5 = vpop.f32.mrf.mxu3 }
 0x34a   :  { %v1898_v35 = vadd.f32 %v1897_v47, %v1849_v20  ;;  %v1949_v63 = vadd.f32 %v1948_v28, %v3444_v59  ;;  %2110 = vadd.xlane.f32.xlu1 %v2109_v57 }
 0x34c   :  { %v2028_v56 = vmul.f32 %v1898_v35, %v3213_v62  ;;  %v1998_v27 = vadd.f32 %v1997_v42, %v1949_v63 }
 0x34e   :  { %v2066_v49 = vmul.f32 %v3457_v2, %v2028_v56  ;;  %v2031_v50 = vmul.f32 %v1998_v27, %v3222_v12  ;;  %v2157_v12 = vlaneseq }
 0x34f   :  { %v1850_v36 = vpop.f32.mrf.mxu2 }
 0x350   :  { %v1851_v46 = vadd.f32 %v1850_v36, %v3447_v33  ;;  %v2112_v44 = vadd.f32 %v2067_v1, %v2066_v49  ;;  %v2069_v62 = vmul.f32 %v3453_v53, %v2031_v50 }
 0x352   :  { %v1900_v9 = vadd.f32 %v1899_v5, %v1851_v46  ;;  %2113 = vadd.xlane.f32.xlu2 %v2112_v44 }
 0x354   :  { %v2030_v59 = vmul.f32 %v1900_v9, %v3219_v11  ;;  %v3553_v11 = vand.u32 127, %v2157_v12 }
 0x356   :  { %v2068_v58 = vmul.f32 %v3457_v2, %v2030_v59  ;;  %v2072_v2 = vpop.xlane.xlu0 %2071  ;;  %v2160_v53 = vadd.s32 4294967288, %v3553_v11  ;;  %v2164_v8 = vadd.s32 4294967280, %v3553_v11  ;;  %v2168_v25 = vadd.s32 4294967272, %v3553_v11 }
 0x357   :  { %v2125_v61 = vadd.f32 %v3551_v52, %v2072_v2  ;;  %v2172_v45 = vadd.s32 4294967264, %v3553_v11  ;;  %v2176_v14 = vadd.s32 4294967256, %v3553_v11  ;;  %v2180_v19 = vadd.s32 4294967248, %v3553_v11 }
 0x358   :  { %v2115_v10 = vadd.f32 %v2069_v62, %v2068_v58  ;;  %v2184_v48 = vadd.s32 4294967240, %v3553_v11  ;;  %v2188_v38 = vadd.s32 4294967232, %v3553_v11  ;;  %v2192_v20 = vadd.s32 4294967224, %v3553_v11 }
 0x359   :  { %v2159_v55 = vperm.slane %v2125_v61, %v3553_v11  ;;  %v2196_v43 = vadd.s32 4294967216, %v3553_v11  ;;  %v2200_v27 = vadd.s32 4294967208, %v3553_v11  ;;  %v2204_v46 = vadd.s32 4294967200, %v3553_v11 }
 0x35a   :  { %2116 = vadd.xlane.f32.xlu0 %v2115_v10  ;;  %v2208_v9 = vadd.s32 4294967192, %v3553_v11  ;;  %v2212_v10 = vadd.s32 4294967184, %v3553_v11  ;;  %v2216_v3 = vadd.s32 4294967176, %v3553_v11 }
 0x35d   :  { %v2075_v23 = vpop.xlane.xlu1 %2074 }
 0x35e   :  { %v2126_v0 = vadd.f32 %v3551_v52, %v2075_v23 }
 0x360   :  { %v2161_v51 = vperm.slane %v2126_v0, %v2160_v53 }
 0x362   :  { %v2163_v13 = vsel %vm2162_vm2, %v2161_v51, %v2159_v55 }
 0x365   :  { %v2078_v37 = vpop.xlane.xlu1 %2077 }
 0x366   :  { %v2127_v60 = vadd.f32 %v3551_v52, %v2078_v37 }
 0x368   :  { %v2165_v7 = vperm.slane %v2127_v60, %v2164_v8 }
 0x36a   :  { %v2167_v21 = vsel %vm2166_vm3, %v2165_v7, %v2163_v13 }
 0x36d   :  { %v2081_v4 = vpop.xlane.xlu2 %2080 }
 0x36e   :  { %v2128_v18 = vadd.f32 %v3551_v52, %v2081_v4 }
 0x370   :  { %v2169_v6 = vperm.slane %v2128_v18, %v2168_v25 }
 0x372   :  { %v2171_v47 = vsel %vm2170_vm4, %v2169_v6, %v2167_v21 }
 0x375   :  { %v2084_v39 = vpop.xlane.xlu2 %2083 }
 0x376   :  { %v2129_v17 = vadd.f32 %v3551_v52, %v2084_v39 }
 0x378   :  { %v2173_v26 = vperm.slane %v2129_v17, %v2172_v45 }
 0x37a   :  { %v2175_v56 = vsel %vm2174_vm5, %v2173_v26, %v2171_v47 }
 0x37d   :  { %v2087_v16 = vpop.xlane.xlu1 %2086 }
 0x37e   :  { %v2130_v54 = vadd.f32 %v3551_v52, %v2087_v16 }
 0x380   :  { %v2177_v31 = vperm.slane %v2130_v54, %v2176_v14 }
 0x382   :  { %v2179_v5 = vsel %vm2178_vm6, %v2177_v31, %v2175_v56 }
 0x385   :  { %v2090_v33 = vpop.xlane.xlu2 %2089 }
 0x386   :  { %v2131_v41 = vadd.f32 %v3551_v52, %v2090_v33 }
 0x388   :  { %v2181_v28 = vperm.slane %v2131_v41, %v2180_v19 }
 0x38a   :  { %v2183_v58 = vsel %vm2182_vm7, %v2181_v28, %v2179_v5 }
 0x38d   :  { %v2093_v22 = vpop.xlane.xlu1 %2092 }
 0x38e   :  { %v2132_v40 = vadd.f32 %v3551_v52, %v2093_v22 }
 0x390   :  { %v2185_v42 = vperm.slane %v2132_v40, %v2184_v48 }
 0x392   :  { %v2187_v4 = vsel %vm2186_vm8, %v2185_v42, %v2183_v58 }
 0x395   :  { %v2096_v15 = vpop.xlane.xlu2 %2095 }
 0x396   :  { %v2133_v32 = vadd.f32 %v3551_v52, %v2096_v15 }
 0x398   :  { %v2189_v36 = vperm.slane %v2133_v32, %v2188_v38 }
 0x39a   :  { %v2191_v39 = vsel %vm2190_vm9, %v2189_v36, %v2187_v4 }
 0x39d   :  { %v2099_v30 = vpop.xlane.xlu1 %2098 }
 0x39e   :  { %v2134_v57 = vadd.f32 %v3551_v52, %v2099_v30 }
 0x3a0   :  { %v2193_v50 = vperm.slane %v2134_v57, %v2192_v20 }
 0x3a2   :  { %v2195_v33 = vsel %vm2194_vm10, %v2193_v50, %v2191_v39 }
 0x3a5   :  { %v2102_v29 = vpop.xlane.xlu2 %2101 }
 0x3a6   :  { %v2135_v35 = vadd.f32 %v3551_v52, %v2102_v29 }
 0x3a8   :  { %v2197_v62 = vperm.slane %v2135_v35, %v2196_v43 }
 0x3aa   :  { %v2199_v15 = vsel %vm2198_vm11, %v2197_v62, %v2195_v33 }
 0x3ad   :  { %v2105_v34 = vpop.xlane.xlu1 %2104 }
 0x3ae   :  { %v2136_v49 = vadd.f32 %v3551_v52, %v2105_v34 }
 0x3b0   :  { %v2201_v37 = vperm.slane %v2136_v49, %v2200_v27 }
 0x3b2   :  { %v2203_v29 = vsel %vm2202_vm12, %v2201_v37, %v2199_v15 }
 0x3b5   :  { %v2108_v24 = vpop.xlane.xlu2 %2107 }
 0x3b6   :  { %v2137_v44 = vadd.f32 %v3551_v52, %v2108_v24 }
 0x3b8   :  { %v2205_v16 = vperm.slane %v2137_v44, %v2204_v46 }
 0x3ba   :  { %v2207_v53 = vsel %vm2206_vm13, %v2205_v16, %v2203_v29 }
 0x3bd   :  { %v2111_v63 = vpop.xlane.xlu1 %2110 }
 0x3be   :  { %v2138_v59 = vadd.f32 %v3551_v52, %v2111_v63 }
 0x3c0   :  { %v2209_v22 = vperm.slane %v2138_v59, %v2208_v9 }
 0x3c2   :  { %v2211_v0 = vsel %vm2210_vm14, %v2209_v22, %v2207_v53 }
 0x3c5   :  { %v2114_v1 = vpop.xlane.xlu2 %2113 }
 0x3c6   :  { %v2139_v23 = vadd.f32 %v3551_v52, %v2114_v1 }
 0x3c8   :  { %v2213_v12 = vperm.slane %v2139_v23, %v2212_v10 }
 0x3ca   :  { %v2215_v8 = vsel %vm2214_vm15, %v2213_v12, %v2211_v0 }
 0x3cd   :  { %v2117_v30 = vpop.xlane.xlu0 %2116 }
 0x3ce   :  { %v2140_v2 = vadd.f32 %v3551_v52, %v2117_v30 }
 0x3d0   :  { %v2217_v61 = vperm.slane %v2140_v2, %v2216_v3 }
 0x3d2   :  { %v2219_v60 = vsel %vm2218_vm0, %v2217_v61, %v2215_v8 }
 0x3d3   :  { %2221 = vst [vmem:[%s3604_s7] sm:$0x1] %v2219_v60 }
 0x3d4   :  { %2226 = vsyncpa [#allocation4], 1 }

</bundles_post_ra>
